<compile_context>
chip_gen: v7x
topology: tpu7x:2x2x1
jax: 0.10.0
libtpu: 0.0.40
codegen_flags: <defaults>
</compile_context>

<pallas_src>
import jax
import jax.numpy as jnp
from jax.experimental import pallas as pl
from jax.experimental.pallas import tpu as pltpu

_BN_EPS = 1e-5
_LANES = 128          # TPU lane width: channel padding target
_SUBLANES = 8         # f32 sublane tile: width padding target


def _round_up(x, m):
    return ((x + m - 1) // m) * m


def _pick_tile(h_out, max_t):
    t = max(1, min(h_out, max_t))
    while h_out % t:
        t -= 1
    return t


# ------------------------------ kernel body -------------------------------- #

def _make_conv_kernel(*, wp, t_out, w_valid, stride, relu, res_mode):
    """3x3 conv (+ folded-BN bias) [+ residual | + fused 1x1 projection] [+ReLU].

    wp:       padded input width (multiple of 8), row-flat stride of the window
    t_out:    output rows produced per grid step
    w_valid:  number of dense (stride-1) output columns that are stored
    stride:   conv stride along H (W stride is applied by the caller)
    res_mode: "none" | "add" (identity residual) | "proj" (fused 1x1 shortcut)
    """
    m_rows = t_out * stride * wp            # GEMM M (includes padded columns)
    lw_data = (stride * t_out + 2) * wp     # rows DMA'd per step (incl. halo)

    def kernel(*refs):
        x_hbm, w_ref, b_ref = refs[0], refs[1], refs[2]
        idx = 3
        res_ref = xs_ref = wsc_ref = None
        if res_mode == "add":
            res_ref = refs[idx]; idx += 1
        elif res_mode == "proj":
            xs_ref, wsc_ref = refs[idx], refs[idx + 1]; idx += 2
        o_ref, xwin_ref, sem = refs[idx], refs[idx + 1], refs[idx + 2]

        b = pl.program_id(0)
        hi = pl.program_id(1)
        row0 = pl.multiple_of(hi * m_rows, 8)

        # Manual DMA of the haloed row window (input stays in HBM / pl.ANY).
        copy = pltpu.make_async_copy(
            x_hbm.at[b, pl.ds(row0, lw_data)],
            xwin_ref.at[pl.ds(0, lw_data)],
            sem,
        )
        copy.start()
        copy.wait()
        # The 2 spare tail rows are only ever read by discarded width-pad
        # columns; keep them finite/deterministic.
        xwin_ref[pl.ds(lw_data, 2), :] = jnp.zeros(
            (2, xwin_ref.shape[1]), xwin_ref.dtype)

        # im2col: 9 shifted row-flat views concatenated along lanes -> one GEMM
        # with K = 9 * Cin_pad (instead of 9 small-K dots).
        taps = [
            xwin_ref[pl.ds(dh * wp + dw, m_rows), :]
            for dh in range(3) for dw in range(3)
        ]
        a = jnp.concatenate(taps, axis=1)                      # (M, 9*Cin_p)
        acc = jnp.dot(a, w_ref[...],
                      preferred_element_type=jnp.float32)      # (M, Cout_p) f32
        acc = acc + b_ref[...]                                 # folded BN bias

        # Single store-side reshape; drop the width-pad (garbage) columns.
        out = acc.reshape(t_out, stride * wp, -1)[:, :w_valid, :]
        if res_mode == "add":
            out = out + res_ref[...].astype(jnp.float32)
        elif res_mode == "proj":
            p = jnp.dot(xs_ref[...], wsc_ref[...],
                        preferred_element_type=jnp.float32)
            out = out + p.reshape(t_out, w_valid, -1)
        if relu:
            out = jnp.maximum(out, 0.0)
        o_ref[...] = out.astype(o_ref.dtype)

    return kernel


# ----------------------------- pallas wrapper ------------------------------ #

def _conv3x3_bn_act(x_cp, w_slab, bias_p, *, stride, relu, out_dtype, tile_h,
                    residual=None, proj=None):
    """Fused 3x3 conv + folded BN [+ residual / fused 1x1 shortcut] [+ ReLU].

    x_cp:   (N, H, W, Cin_pad) activations in the MXU compute dtype (bf16)
    w_slab: (9*Cin_pad, Cout_pad) BN-scale-folded weights
    bias_p: (1, Cout_pad) folded BN bias (f32)
    Returns (N, H // stride, W, Cout_pad); caller applies the W stride.
    """
    n, h_in, w_in, cp_in = x_cp.shape
    cp_out = int(w_slab.shape[-1])
    assert h_in % stride == 0, "spatial dims must be divisible by the stride"
    h_out = h_in // stride
    wp = _round_up(w_in + 2, _SUBLANES)

    # Halo + alignment pad, then flatten rows so the kernel window is 2D
    # (rows = spatial, lanes = channels) end-to-end.
    xp = jnp.pad(x_cp, ((0, 0), (1, 1), (1, wp - w_in - 1), (0, 0)))
    x_flat = xp.reshape(n, (h_in + 2) * wp, cp_in)

    t = _pick_tile(h_out, tile_h)
    ht = h_out // t
    lw = (stride * t + 2) * wp + 2          # window rows + 2 spare rows

    in_specs = [
        pl.BlockSpec(memory_space=pl.ANY),                        # x in HBM
        pl.BlockSpec((9 * cp_in, cp_out), lambda b, i: (0, 0)),   # weight slab
        pl.BlockSpec((1, cp_out), lambda b, i: (0, 0)),           # BN bias
    ]
    args = [x_flat, w_slab, bias_p]
    res_mode = "none"
    flops = 2 * n * ht * (t * stride * wp) * (9 * cp_in) * cp_out

    if residual is not None:
        res_mode = "add"
        in_specs.append(pl.BlockSpec((pl.Squeezed(), t, w_in, cp_out),
                                     lambda b, i: (b, i, 0, 0)))
        args.append(residual)
    elif proj is not None:
        res_mode = "proj"
        xs_flat, wsc = proj
        cp_sc = int(xs_flat.shape[-1])
        in_specs.append(pl.BlockSpec((pl.Squeezed(), t * w_in, cp_sc),
                                     lambda b, i: (b, i, 0)))
        in_specs.append(pl.BlockSpec((cp_sc, cp_out), lambda b, i: (0, 0)))
        args += [xs_flat, wsc]
        flops += 2 * n * ht * (t * w_in) * cp_sc * cp_out

    out_bytes = n * h_out * w_in * cp_out * jnp.dtype(out_dtype).itemsize
    bytes_accessed = out_bytes + sum(
        int(a.size) * a.dtype.itemsize for a in args)

    kernel = _make_conv_kernel(wp=wp, t_out=t, w_valid=w_in, stride=stride,
                               relu=relu, res_mode=res_mode)

    return pl.pallas_call(
        kernel,
        grid=(n, ht),
        in_specs=in_specs,
        out_specs=pl.BlockSpec((pl.Squeezed(), t, w_in, cp_out),
                               lambda b, i: (b, i, 0, 0)),
        out_shape=jax.ShapeDtypeStruct((n, h_out, w_in, cp_out), out_dtype),
        scratch_shapes=[pltpu.VMEM((lw, cp_in), x_cp.dtype),
                        pltpu.SemaphoreType.DMA(())],
        compiler_params=pltpu.CompilerParams(
            dimension_semantics=("parallel", "parallel"),
            vmem_limit_bytes=32 * 1024 * 1024),
        cost_estimate=pl.CostEstimate(flops=int(flops), transcendentals=0,
                                      bytes_accessed=int(bytes_accessed)),
    )(*args)


# ------------------------------ module logic ------------------------------- #

def _fold_bn(bn):
    scale = bn["gamma"] / jnp.sqrt(bn["var"] + _BN_EPS)
    bias = bn["beta"] - bn["mean"] * scale
    return scale, bias


def _fold_weight_slab(w, scale, cp_in, cp_out, dtype):
    """(3,3,Cin,Cout) HWIO -> (9*Cin_pad, Cout_pad) with BN scale folded in."""
    kh, kw, ci, co = w.shape
    wf = w * scale[None, None, None, :]
    slab = jnp.zeros((kh, kw, cp_in, cp_out), jnp.float32)
    slab = slab.at[:, :, :ci, :co].set(wf)
    return slab.reshape(kh * kw * cp_in, cp_out).astype(dtype)


def _fold_proj_slab(w, scale, cp_in, cp_out, dtype):
    ci, co = w.shape
    slab = jnp.zeros((cp_in, cp_out), jnp.float32)
    slab = slab.at[:ci, :co].set(w * scale[None, :])
    return slab.astype(dtype)


def _pad_bias(b, cp_out):
    return jnp.zeros((1, cp_out), jnp.float32).at[0, :b.shape[0]].set(b)


def resnet_block(x_nchw, params, stride=1, *, tile_h=8,
                 compute_dtype=jnp.bfloat16):
    """Forward pass of ResNetBlock. Input/output are NCHW (PyTorch layout)."""
    n, c_in, h, w = x_nchw.shape
    c_out = params["w1"].shape[-1]
    cp_in = _round_up(c_in, _LANES)
    cp_out = _round_up(c_out, _LANES)

    # NCHW -> NHWC, lane-pad channels, cast to the MXU dtype (one relayout).
    x = jnp.transpose(x_nchw, (0, 2, 3, 1))
    x = jnp.pad(x, ((0, 0), (0, 0), (0, 0), (0, cp_in - c_in)))
    x = x.astype(compute_dtype)

    # conv1 + bn1 + relu
    s1, b1 = _fold_bn(params["bn1"])
    w1 = _fold_weight_slab(params["w1"], s1, cp_in, cp_out, compute_dtype)
    out1 = _conv3x3_bn_act(x, w1, _pad_bias(b1, cp_out), stride=stride,
                           relu=True, out_dtype=compute_dtype, tile_h=tile_h)
    if stride != 1:
        # H stride is handled in-kernel; W stride is a cheap subsample of the
        # already-small conv1 output.
        out1 = out1[:, :, ::stride, :]

    # conv2 + bn2 + shortcut + relu, all in one fused kernel
    s2, b2 = _fold_bn(params["bn2"])
    w2 = _fold_weight_slab(params["w2"], s2, cp_out, cp_out, compute_dtype)

    if stride != 1 or c_in != c_out:
        ssc, bsc = _fold_bn(params["bn_sc"])
        wsc = _fold_proj_slab(params["w_sc"], ssc, cp_in, cp_out, compute_dtype)
        xs = x[:, ::stride, ::stride, :]
        xs_flat = xs.reshape(n, xs.shape[1] * xs.shape[2], cp_in)
        out = _conv3x3_bn_act(out1, w2, _pad_bias(b2 + bsc, cp_out), stride=1,
                              relu=True, out_dtype=jnp.float32, tile_h=tile_h,
                              proj=(xs_flat, wsc))
    else:
        out = _conv3x3_bn_act(out1, w2, _pad_bias(b2, cp_out), stride=1,
                              relu=True, out_dtype=jnp.float32, tile_h=tile_h,
                              residual=x)

    out = out[..., :c_out]
    return jnp.transpose(out, (0, 3, 1, 2))        # NHWC -> NCHW


def init_params(key, in_channels, out_channels, stride=1):
    ks = jax.random.split(key, 12)

    def bn_params(k, c):
        kg, kb, km, kv = jax.random.split(k, 4)
        return dict(
            gamma=jax.random.uniform(kg, (c,), jnp.float32, 0.5, 1.5),
            beta=0.1 * jax.random.normal(kb, (c,), jnp.float32),
            mean=0.1 * jax.random.normal(km, (c,), jnp.float32),
            var=jax.random.uniform(kv, (c,), jnp.float32, 0.5, 1.5),
        )

    params = dict(
        w1=0.1 * jax.random.normal(ks[0], (3, 3, in_channels, out_channels),
                                   jnp.float32),
        bn1=bn_params(ks[1], out_channels),
        w2=0.1 * jax.random.normal(ks[2], (3, 3, out_channels, out_channels),
                                   jnp.float32),
        bn2=bn_params(ks[3], out_channels),
    )
    if stride != 1 or in_channels != out_channels:
        params["w_sc"] = 0.1 * jax.random.normal(
            ks[4], (in_channels, out_channels), jnp.float32)
        params["bn_sc"] = bn_params(ks[5], out_channels)
    return params


def _reference(x_nchw, params, stride=1, compute_dtype=jnp.bfloat16):
    """Pure-JAX reference, emulating the kernel's bf16 operand rounding."""
    def q(a):
        return a.astype(compute_dtype).astype(jnp.float32)

    x = q(jnp.transpose(x_nchw, (0, 2, 3, 1)))
    dn = ("NHWC", "HWIO", "NHWC")
    c_in = x.shape[-1]
    c_out = params["w1"].shape[-1]

    s1, b1 = _fold_bn(params["bn1"])
    w1 = q(params["w1"] * s1[None, None, None, :])
    out = jax.lax.conv_general_dilated(x, w1, (stride, stride),
                                       ((1, 1), (1, 1)),
                                       dimension_numbers=dn) + b1
    out = q(jnp.maximum(out, 0.0))          # intermediate is stored in bf16

    s2, b2 = _fold_bn(params["bn2"])
    w2 = q(params["w2"] * s2[None, None, None, :])
    out = jax.lax.conv_general_dilated(out, w2, (1, 1), ((1, 1), (1, 1)),
                                       dimension_numbers=dn) + b2

    if stride != 1 or c_in != c_out:
        ssc, bsc = _fold_bn(params["bn_sc"])
        wsc = q(params["w_sc"] * ssc[None, :])
        sc = x[:, ::stride, ::stride, :] @ wsc + bsc
    else:
        sc = x

    out = jnp.maximum(out + sc, 0.0)
    return jnp.transpose(out, (0, 3, 1, 2))


if __name__ == "__main__":
    key = jax.random.PRNGKey(0)
    kx, kp, kp2 = jax.random.split(key, 3)

    N, C, H, W = 2, 4, 16, 16
    x = jax.random.normal(kx, (N, C, H, W), jnp.float32)

    # Test 1: identity shortcut (stride=1, in_channels == out_channels).
    params = init_params(kp, C, C, stride=1)
    out = jax.block_until_ready(resnet_block(x, params, stride=1))
    ref = _reference(x, params, stride=1)
    assert out.shape == (N, C, H, W), out.shape
    err1 = float(jnp.max(jnp.abs(out - ref)))

    # Test 2: strided block with fused 1x1 projection shortcut.
    C2 = 8
    params2 = init_params(kp2, C, C2, stride=2)
    out2 = jax.block_until_ready(resnet_block(x, params2, stride=2))
    ref2 = _reference(x, params2, stride=2)
    assert out2.shape == (N, C2, H // 2, W // 2), out2.shape
    err2 = float(jnp.max(jnp.abs(out2 - ref2)))

    if err1 > 1e-2 or err2 > 1e-2:
        raise AssertionError(
            f"Pallas kernel mismatch vs reference: {err1:.2e} / {err2:.2e}")
    print("KERNEL_OK")
</pallas_src>

<mosaic_0001>
module attributes {stable_mosaic.version = 11 : i64} {
  func.func @kernel(%arg0: i32, %arg1: i32, %arg2: memref<2x432x128xbf16, #tpu.memory_space<any>>, %arg3: memref<1152x128xbf16, #tpu.memory_space<vmem>>, %arg4: memref<1x128xf32, #tpu.memory_space<vmem>>, %arg5: memref<1x8x16x128xbf16, #tpu.memory_space<vmem>>, %arg6: memref<242x128xbf16, #tpu.memory_space<vmem>>, %arg7: memref<!tpu.dma_semaphore, #tpu.memory_space<semaphore_mem>>) attributes {dimension_semantics = [#tpu.dimension_semantics<parallel>, #tpu.dimension_semantics<parallel>], iteration_bounds = array<i64: 2, 2>, scalar_prefetch = 0 : i64, scratch_operands = 2 : i64, tpu.core_type = #tpu.core_type<tc>, window_params = [{}, {pipeline_mode = #tpu.pipeline_mode<synchronous>, transform_indices = @transform_1, window_bounds = array<i64: 1152, 128>}, {pipeline_mode = #tpu.pipeline_mode<synchronous>, transform_indices = @transform_2, window_bounds = array<i64: 1, 128>}, {transform_indices = @transform_3, window_bounds = array<i64: 1, 8, 16, 128>}]} {
    %c192_i32 = arith.constant 192 : i32
    %0 = arith.muli %arg1, %c192_i32 : i32
    %1 = tpu.assume_multiple %0, 8 : i32
    %c0_i32 = arith.constant 0 : i32
    %2 = tpu.memref_slice %arg2[%arg0, %1, %c0_i32] : memref<2x432x128xbf16, #tpu.memory_space<any>> -> memref<1x240x128xbf16, #tpu.memory_space<any>>
    %3 = tpu.memref_squeeze %2 : memref<1x240x128xbf16, #tpu.memory_space<any>> -> memref<240x128xbf16, #tpu.memory_space<any>>
    %c0_i32_0 = arith.constant 0 : i32
    %c0_i32_1 = arith.constant 0 : i32
    %4 = tpu.memref_slice %arg6[%c0_i32_0, %c0_i32_1] : memref<242x128xbf16, #tpu.memory_space<vmem>> -> memref<240x128xbf16, #tpu.memory_space<vmem>>
    tpu.enqueue_dma source(%3 : memref<240x128xbf16, #tpu.memory_space<any>>) target(%4 : memref<240x128xbf16, #tpu.memory_space<vmem>>) target_semaphore(%arg7 : memref<!tpu.dma_semaphore, #tpu.memory_space<semaphore_mem>>)
    %c0_i32_2 = arith.constant 0 : i32
    %5 = tpu.memref_slice %arg2[%arg0, %1, %c0_i32_2] : memref<2x432x128xbf16, #tpu.memory_space<any>> -> memref<1x240x128xbf16, #tpu.memory_space<any>>
    %6 = tpu.memref_squeeze %5 : memref<1x240x128xbf16, #tpu.memory_space<any>> -> memref<240x128xbf16, #tpu.memory_space<any>>
    %c0_i32_3 = arith.constant 0 : i32
    %c0_i32_4 = arith.constant 0 : i32
    %7 = tpu.memref_slice %arg6[%c0_i32_3, %c0_i32_4] : memref<242x128xbf16, #tpu.memory_space<vmem>> -> memref<240x128xbf16, #tpu.memory_space<vmem>>
    tpu.wait_dma2 semaphore(%arg7 : memref<!tpu.dma_semaphore, #tpu.memory_space<semaphore_mem>>) src(%6 : memref<240x128xbf16, #tpu.memory_space<any>>) dst(%7 : memref<240x128xbf16, #tpu.memory_space<vmem>>)
    %cst = arith.constant 0.000000e+00 : bf16
    %8 = vector.broadcast %cst : bf16 to vector<2x128xbf16>
    %c240 = arith.constant 240 : index
    %c0 = arith.constant 0 : index
    %9 = vector.load %arg6[%c240, %c0] : memref<242x128xbf16, #tpu.memory_space<vmem>>, vector<2x128xbf16>
    tpu.vector_store %arg6[%c240, %c0], %8 {strides = array<i32>} : memref<242x128xbf16, #tpu.memory_space<vmem>>, vector<2x128xbf16>,
    %c0_5 = arith.constant 0 : index
    %c0_6 = arith.constant 0 : index
    %10 = vector.load %arg6[%c0_5, %c0_6] : memref<242x128xbf16, #tpu.memory_space<vmem>>, vector<192x128xbf16>
    %c1 = arith.constant 1 : index
    %c0_7 = arith.constant 0 : index
    %11 = vector.load %arg6[%c1, %c0_7] : memref<242x128xbf16, #tpu.memory_space<vmem>>, vector<192x128xbf16>
    %c2 = arith.constant 2 : index
    %c0_8 = arith.constant 0 : index
    %12 = vector.load %arg6[%c2, %c0_8] : memref<242x128xbf16, #tpu.memory_space<vmem>>, vector<192x128xbf16>
    %c24 = arith.constant 24 : index
    %c0_9 = arith.constant 0 : index
    %13 = vector.load %arg6[%c24, %c0_9] : memref<242x128xbf16, #tpu.memory_space<vmem>>, vector<192x128xbf16>
    %c25 = arith.constant 25 : index
    %c0_10 = arith.constant 0 : index
    %14 = vector.load %arg6[%c25, %c0_10] : memref<242x128xbf16, #tpu.memory_space<vmem>>, vector<192x128xbf16>
    %c26 = arith.constant 26 : index
    %c0_11 = arith.constant 0 : index
    %15 = vector.load %arg6[%c26, %c0_11] : memref<242x128xbf16, #tpu.memory_space<vmem>>, vector<192x128xbf16>
    %c48 = arith.constant 48 : index
    %c0_12 = arith.constant 0 : index
    %16 = vector.load %arg6[%c48, %c0_12] : memref<242x128xbf16, #tpu.memory_space<vmem>>, vector<192x128xbf16>
    %c49 = arith.constant 49 : index
    %c0_13 = arith.constant 0 : index
    %17 = vector.load %arg6[%c49, %c0_13] : memref<242x128xbf16, #tpu.memory_space<vmem>>, vector<192x128xbf16>
    %c50 = arith.constant 50 : index
    %c0_14 = arith.constant 0 : index
    %18 = vector.load %arg6[%c50, %c0_14] : memref<242x128xbf16, #tpu.memory_space<vmem>>, vector<192x128xbf16>
    %19 = tpu.concatenate %10, %11, %12, %13, %14, %15, %16, %17, %18 in 1 : vector<192x128xbf16>, vector<192x128xbf16>, vector<192x128xbf16>, vector<192x128xbf16>, vector<192x128xbf16>, vector<192x128xbf16>, vector<192x128xbf16>, vector<192x128xbf16>, vector<192x128xbf16> -> vector<192x1152xbf16>
    %c0_15 = arith.constant 0 : index
    %c0_16 = arith.constant 0 : index
    %20 = vector.load %arg3[%c0_15, %c0_16] : memref<1152x128xbf16, #tpu.memory_space<vmem>>, vector<1152x128xbf16>
    %cst_17 = arith.constant dense<0.000000e+00> : vector<192x128xf32>
    %21 = tpu.matmul %19, %20, %cst_17 {dimension_numbers = #tpu.dot_dimension_numbers<[1], [0], [0], [1], [0, 0, 1, 1], [], []>} : vector<192x1152xbf16>, vector<1152x128xbf16>, vector<192x128xf32> -> vector<192x128xf32>
    %c0_18 = arith.constant 0 : index
    %c0_19 = arith.constant 0 : index
    %22 = vector.load %arg4[%c0_18, %c0_19] : memref<1x128xf32, #tpu.memory_space<vmem>>, vector<1x128xf32>
    %23 = vector.broadcast %22 : vector<1x128xf32> to vector<192x128xf32>
    %24 = arith.addf %21, %23 : vector<192x128xf32>
    %25 = vector.shape_cast %24 : vector<192x128xf32> to vector<8x24x128xf32>
    %26 = vector.extract_strided_slice %25 {offsets = [0, 0, 0], sizes = [8, 16, 128], strides = [1, 1, 1]} : vector<8x24x128xf32> to vector<8x16x128xf32>
    %cst_20 = arith.constant 0.000000e+00 : f32
    %27 = vector.broadcast %cst_20 : f32 to vector<8x16x128xf32>
    %28 = arith.maximumf %26, %27 : vector<8x16x128xf32>
    %29 = arith.truncf %28 : vector<8x16x128xf32> to vector<8x16x128xbf16>
    %c0_21 = arith.constant 0 : index
    %c0_22 = arith.constant 0 : index
    %c0_23 = arith.constant 0 : index
    %c0_24 = arith.constant 0 : index
    %30 = vector.load %arg5[%c0_21, %c0_22, %c0_23, %c0_24] : memref<1x8x16x128xbf16, #tpu.memory_space<vmem>>, vector<1x8x16x128xbf16>
    %31 = vector.shape_cast %30 : vector<1x8x16x128xbf16> to vector<8x16x128xbf16>
    %32 = vector.shape_cast %29 : vector<8x16x128xbf16> to vector<1x8x16x128xbf16>
    tpu.vector_store %arg5[%c0_21, %c0_22, %c0_23, %c0_24], %32 {strides = array<i32>} : memref<1x8x16x128xbf16, #tpu.memory_space<vmem>>, vector<1x8x16x128xbf16>,
    return
  }
  func.func @transform_1(%arg0: i32, %arg1: i32) -> (i32, i32) {
    %c0_i32 = arith.constant 0 : i32
    %c0_i32_0 = arith.constant 0 : i32
    %c0_i32_1 = arith.constant 0 : i32
    return %c0_i32, %c0_i32_0 : i32, i32
  }
  func.func @transform_2(%arg0: i32, %arg1: i32) -> (i32, i32) {
    %c0_i32 = arith.constant 0 : i32
    %c0_i32_0 = arith.constant 0 : i32
    %c0_i32_1 = arith.constant 0 : i32
    return %c0_i32, %c0_i32_0 : i32, i32
  }
  func.func @transform_3(%arg0: i32, %arg1: i32) -> (i32, i32, i32, i32) {
    %c0_i32 = arith.constant 0 : i32
    %c0_i32_0 = arith.constant 0 : i32
    %c0_i32_1 = arith.constant 0 : i32
    return %arg0, %arg1, %c0_i32, %c0_i32_0 : i32, i32, i32, i32
  }
}

</mosaic_0001>

<bundles_post_ra>
// kernel: tpu_custom_call.1
= control target key start
LH: loop header
LB: loop body
LE: loop exit
PB: predicated region body
PF: predicated region fallthrough
CT: control target
= control target key end

     0   :  { %s3834_s0 = inlined_call_operand.hbm [shape: bf16[2,432,128], index: 0, kind: input, shape index: {}]   ;;  %s3835_s1 = inlined_call_operand.hbm [shape: bf16[1152,128], index: 1, kind: input, shape index: {}]   ;;  %s3836_s2 = inlined_call_operand.vmem [shape: f32[1,128], index: 2, kind: input, shape index: {}]   ;;  %s3837_s3 = inlined_call_operand.hbm [shape: bf16[2,16,16,128], index: 3, kind: output, shape index: {}]  }
   0x1   :  { %3851 = sst [smem:[#allocation22_spill]] %s3835_s1 }
   0x2   :  { %8 = vsyncpa [#allocation5], 0 }
   0x3   :  { %9 = vsyncpa [#allocation6], 0 }
   0x4   :  { %11 = vsyncpa [#allocation6 + $0x1], 0  ;;  %s3085_s12 = smov 0   ;;  %s3087_s13 = smov 0  }
   0x5   :  { %s3089_s14 = smov 0   ;;  %s3091_s15 = smov 0  }
   0x6   :  { %s3093_s16 = smov 0   ;;  %s3095_s17 = smov 0  }
   0x7   :  { %s3097_s18 = smov 0   ;;  %s3099_s19 = smov 0  }
   0x8 LB: > { %3852 = sst [smem:[#allocation15_spill]] %s3051_s18  ;;  %s2080_s20 = sadd.s32 4294967295, %s3055_s19   ;;  %s3055_s19 = sphi %s3099_s19, %s17_s19   ;;  %s3051_s18 = sphi %s3097_s18, %s3881_s18   ;;  %s3047_s17 = sphi %s3095_s17, %s3886_s17   ;;  %s3043_s16 = sphi %s3093_s16, %s3879_s16   ;;  %s3039_s15 = sphi %s3091_s15, %s3885_s15   ;;  %s3035_s14 = sphi %s3089_s14, %s3884_s14   ;;  %s3031_s13 = sphi %s3087_s13, %s3883_s13   ;;  %s3027_s12 = sphi %s3085_s12, %s3882_s12  }
   0x9   : > { %s2081_s21 = sadd.s32 4294967294, %s3055_s19   ;;  %s26_s22 = sadd.s32 1, %s3047_s17 }
   0xa   : > { %s29_s23 = sadd.s32 1, %s3051_s18  ;;  %p27_p0 = scmp.ge.s32.totalorder %s26_s22, 2 }
   0xb   : > { %s80_s24 = sadd.s32 1, %s3035_s14  ;;  %p90_p1 = scmp.ne.s32.totalorder %s3035_s14, %s3031_s13 }
   0xc   : > { %p91_p2 = scmp.eq.s32.totalorder %s2080_s20, 3  ;;  %s3888_s22 = smov (%p27_p0, %s26_s22), 0 }
   0xd   : > { %3853 = sst [smem:[#allocation16_spill]] %s3888_s22  ;;  %s3890_s23 = smov (!%p27_p0, %s29_s23), %s3051_s18 }
   0xe   : > { %s76_s25 = ssub.s32 %s3047_s17, %s3888_s22  ;;  %p3137_p3 = por %p91_p2, %p90_p1 }
   0xf   : > { %p31_p4 = scmp.ge.s32.totalorder %s3890_s23, 2  ;;  %p96_p5 = scmp.ne.s32.totalorder %s3031_s13, %s3027_s12 }
  0x10   : > { %s3854_s26 = scalar_select %p3137_p3, 1, 0 }
  0x11   : > { %p97_p6 = scmp.eq.s32.totalorder %s2081_s21, 3  ;;  %p2082_p7 = scmp.ge.s32.totalorder %s3055_s19, 1 }
  0x12   : > { %s3892_s23 = smov (%p31_p4, %s3890_s23), 0  ;;  %p104_p9 = scmp.lt.s32.totalorder %s3055_s19, 5 }
  0x13   : > { %3855 = sst [smem:[#allocation17_spill]] %s3892_s23  ;;  %p3146_p8 = por %p97_p6, %p96_p5 }
  0x14   : > { %s75_s28 = ssub.s32 %s3051_s18, %s3892_s23  ;;  %p3153_p10 = pnand %p2082_p7, %p104_p9 }
  0x15   : > { %s3856_s27 = scalar_select %p3146_p8, 1, 0 }
  0x16   : > { %s77_s29 = sor.u32 %s76_s25, %s75_s28  ;;  %p3157_p12 = scmp.eq.s32.totalorder %s2080_s20, 0 }
  0x17   : > { %s3857_s30 = scalar_select %p3153_p10, 1, 0 }
  0x18   : > { %p78_p11 = scmp.eq.s32.totalorder %s77_s29, 0  ;;  %p2716_p13 = pneg %p3153_p10 }
  0x19   : > { %s3858_s4 = scalar_select %p3157_p12, 1, 0 }
  0x1a   : > { %s3164_s5 = scalar_select %p78_p11, %s3035_s14, %s80_s24  }
  0x1b   : > { %s3057_s6 = smov [#allocation4]   ;;  %p3168_p0 = pnand %p3157_p12, %p2716_p13 }
  0x1c   : > { %s116_s7 = sshll.u32 %s3057_s6, 4  ;;  %s3860_s1 = sld [smem:[#allocation22_spill]]  ;;  %s117_s7 = int_to_ptr.vmem [resolvable:$true] %s116_s7 }
  0x1d   : > { %p2905_p2 = pneg %p3168_p0 }
  0x22   : > { %s2903_s11 = scalar_lea.hbm %s3860_s1, 9216 }
  0x23   : > { %p2904_p1 = scmp.ne.s32.totalorder %s3860_s1, %s2903_s11  ;;  %p2910_p6 = scmp.lt.u32.totalorder %s2903_s11, %s3860_s1 }
  0x25   : > { %p2906_p4 = pnand %p2905_p2, %p2904_p1 }
  0x27   : > { %p2907_p5 = pneg %p2906_p4 }
  0x29   : > { %p2912_p7 = pnand %p2910_p6, %p2907_p5 }
  0x2b   : > { %2915 = shalt.err (!%p2912_p7)
}
  0x2c   : > { %s2916_s28 = scalar_lea.vmem %s117_s7, 9216  ;;  %p2924_p8 = scmp.lt.s32.totalorder %s117_s7, %s117_s7 }
  0x2d   : > { %p2917_p9 = scmp.ne.s32.totalorder %s117_s7, %s2916_s28  ;;  %p2925_p3 = scmp.lt.s32.totalorder %s2916_s28, %s2916_s28 }
  0x2f   : > { %p2919_p11 = pnand %p2917_p9, %p2905_p2  ;;  %p2926_p12 = por %p2925_p3, %p2924_p8 }
  0x31   : > { %p2920_p13 = pneg %p2919_p11 }
  0x33   : > { %p2927_p10 = pnand %p2926_p12, %p2920_p13 }
  0x35   : > { %2930 = shalt.err (!%p2927_p10)
}
  0x36   : > { %s3058_s29 = smov 64   ;;  %s3059_s6 = smov 4  }
  0x37   : > { %2719 = dma.hbm_to_vmem [thread:$0]  (!%p3168_p0), %s3860_s1, 9216, %s117_s7, [#allocation5], %s3058_s29, %s3058_s29, %s3059_s6  }
  0x38   : > { %p3861_p1 = scmp.ne.s32.totalorder %s3857_s30, 0 }
  0x3a   : > { %135 = sbr.rel (%p3861_p1) target bundleno = 575 (0x23f), region = 28 }
  0x41   : > { %p3862_p4 = scmp.ne.s32.totalorder %s3858_s4, 0 }
  0x43   : > { %3016 = dma.done.wait (%p3862_p4), [#allocation5], 9216  }
  0x44   : > { %3018 = vsyncadd (%p3862_p4), [#allocation5], 4294958080  ;;  %s149_s11 = sand.u32 1, %s3031_s13   ;;  %s154_s20 = smul.u32 192, %s3039_s15 }
  0x45   : > { %s2086_s8 = sshll.u32 %s149_s11, 6  ;;  %s157_s21 = smul.u32 54, %s3043_s16 }
  0x46   : > { %s155_s24 = sshra.s32 %s154_s20, 3  ;;  %s3060_s30 = smov [#allocation2]  }
  0x47   : > { %s158_s7 = sadd.s32 %s157_s21, %s155_s24  ;;  %s168_s28 = sshll.u32 %s3060_s30, 4  ;;  %s169_s28 = int_to_ptr.vmem [resolvable:$true] %s168_s28 }
  0x48   : > { %s2087_s25 = sshll.u32 %s158_s7, 6  ;;  %s2933_s23 = scalar_lea.hbm %s3834_s0, 6912 }
  0x49   : > { %s160_s9 = scalar_lea.hbm %s3834_s0, %s2087_s25 }
  0x4a   : > { %s2931_s4 = scalar_lea.hbm %s160_s9, 1920  ;;  %p2934_p8 = scmp.lt.u32.totalorder %s160_s9, %s3834_s0 }
  0x4b   : > { %p2932_p3 = scmp.ne.s32.totalorder %s160_s9, %s2931_s4  ;;  %p2935_p10 = scmp.lt.u32.totalorder %s2933_s23, %s2931_s4 }
  0x4c   : > { %p2937_p0 = scmp.lt.u32.totalorder %s2931_s4, %s160_s9 }
  0x4d   : > { %p2936_p12 = por %p2935_p10, %p2934_p8 }
  0x4f   : > { %p2938_p2 = por %p2937_p0, %p2936_p12 }
  0x51   : > { %p2939_p5 = pnand %p2938_p2, %p2932_p3 }
  0x53   : > { %2942 = shalt.err (!%p2939_p5)  }
  0x54   : > { %s2943_s20 = scalar_lea.vmem %s169_s28, 1920  ;;  %s2947_s21 = scalar_lea.vmem %s169_s28, 1984 }
  0x55   : > { %p2944_p6 = scmp.ne.s32.totalorder %s169_s28, %s2943_s20  ;;  %p2948_p7 = scmp.lt.s32.totalorder %s169_s28, %s169_s28 }
  0x56   : > { %p2949_p9 = scmp.lt.s32.totalorder %s2947_s21, %s2943_s20 }
  0x58   : > { %p2950_p11 = por %p2949_p9, %p2948_p7 }
  0x5a   : > { %p2951_p13 = pnand %p2950_p11, %p2944_p6 }
  0x5c   : > { %2954 = shalt.err (!%p2951_p13)  }
  0x5d   : > { %171 = dma.hbm_to_vmem [thread:$0]  %s160_s9, 1920, %s169_s28, [#allocation3] }
  0x5e   : > { %s3208_s1 = scalar_lea.vmem [#allocation7], %s2086_s8 }
  0x5f   : > { %3019 = dma.done.wait [#allocation3], 1920 }
  0x60   : > { %3020 = vsyncadd [#allocation3], 4294965376  ;;  %v2798_v0 = vld [vmem:[#allocation4 + $0x40] sm:$0xff]   ;;  %v2802_v4 = vld [vmem:[#allocation4 + $0x48] sm:$0xff]   ;;  %vm288_vm0 = vsmask.f32 7424 }
  0x61   : > { %v2799_v1 = vld [vmem:[#allocation4 + $0xc0] sm:$0xff]   ;;  %2282 = vmatprep.subr.bf16.mxu0 %v2798_v0  ;;  %v2803_v5 = vld [vmem:[#allocation4 + $0xc8] sm:$0xff]   ;;  %v2806_v8 = vld [vmem:[#allocation4 + $0x50] sm:$0xff]   ;;  %vm404_vm1 = vcmask 1046528   ;;  %s2234_s23 = sshll.u32 %s3039_s15, 4  ;;  %s2213_s8 = sshll.u32 %s3043_s16, 5 }
  0x62   : > { %v2800_v2 = vld [vmem:[#allocation4] sm:$0xff]   ;;  %2370 = vmatprep.subr.bf16.mxu1 %v2799_v1  ;;  %v2804_v6 = vld [vmem:[#allocation4 + $0x8] sm:$0xff]   ;;  %v2807_v9 = vld [vmem:[#allocation4 + $0xd0] sm:$0xff]   ;;  %s1991_s24 = sadd.s32 %s2234_s23, %s2213_s8  ;;  %s1994_s16 = sshll.u32 %s3208_s1, 4  ;;  %s3777_s16 = int_to_ptr.vmem [resolvable:$true] %s1994_s16 }
  0x63   : > { %v2801_v3 = vld [vmem:[#allocation4 + $0x80] sm:$0xff]   ;;  %2283 = vmatpush3.bf16.msra.mxu0 %v2800_v2  ;;  %v2805_v7 = vld [vmem:[#allocation4 + $0x88] sm:$0xff]   ;;  %v2808_v10 = vld [vmem:[#allocation4 + $0x10] sm:$0xff]   ;;  %s2214_s15 = sshll.u32 %s1991_s24, 6  ;;  %s3782_s28 = scalar_lea.sflag [#allocation6], %s149_s11 }
  0x64   : > { %2371 = vmatpush3.bf16.msra.mxu1 %v2801_v3  ;;  %2284 = vmatprep.subr.bf16.mxu0 %v2802_v4  ;;  %v2809_v11 = vld [vmem:[#allocation4 + $0x90] sm:$0xff]   ;;  %v2810_v12 = vld [vmem:[#allocation4 + $0x58] sm:$0xff]   ;;  %v2814_v16 = vld [vmem:[#allocation4 + $0x60] sm:$0xff]   ;;  %s3775_s30 = scalar_lea.hbm %s3837_s3, %s2214_s15  ;;  %s2955_s29 = scalar_lea.vmem %s3777_s16, 1024 }
  0x65   : > { %2372 = vmatprep.subr.bf16.mxu1 %v2803_v5  ;;  %v2811_v13 = vld [vmem:[#allocation4 + $0xd8] sm:$0xff]   ;;  %v2815_v17 = vld [vmem:[#allocation4 + $0xe0] sm:$0xff]   ;;  %v2818_v20 = vld [vmem:[#allocation4 + $0x68] sm:$0xff]   ;;  %p2956_p1 = scmp.ne.s32.totalorder %s3777_s16, %s2955_s29  ;;  %p3877_p4 = scmp.ne.s32.totalorder %s3854_s26, 0 }
  0x66   : > { %v2812_v14 = vld [vmem:[#allocation4 + $0x18] sm:$0xff]   ;;  %v2816_v18 = vld [vmem:[#allocation4 + $0x20] sm:$0xff]   ;;  %v2819_v21 = vld [vmem:[#allocation4 + $0xe8] sm:$0xff]   ;;  %s3062_s6 = smov [#allocation7]  }
  0x67   : > { %2285 = vmatpush3.bf16.msra.mxu0 %v2804_v6  ;;  %v2813_v15 = vld [vmem:[#allocation4 + $0x98] sm:$0xff]   ;;  %v2817_v19 = vld [vmem:[#allocation4 + $0xa0] sm:$0xff]   ;;  %v2820_v22 = vld [vmem:[#allocation4 + $0x28] sm:$0xff]   ;;  %p2957_p3 = pnand %p2956_p1, %p3877_p4  ;;  %s2959_s9 = sshll.u32 %s3062_s6, 4  ;;  %s2960_s9 = int_to_ptr.vmem [resolvable:$false] %s2959_s9 }
  0x68   : > { %2373 = vmatpush3.bf16.msra.mxu1 %v2805_v7  ;;  %2286 = vmatprep.subr.bf16.mxu0 %v2806_v8  ;;  %v2821_v23 = vld [vmem:[#allocation4 + $0xa8] sm:$0xff]   ;;  %v2822_v24 = vld [vmem:[#allocation4 + $0x70] sm:$0xff]   ;;  %v2826_v28 = vld [vmem:[#allocation4 + $0x78] sm:$0xff]   ;;  %s2961_s4 = scalar_lea.vmem %s2960_s9, 2048  ;;  %p2962_p10 = scmp.lt.s32.totalorder %s3777_s16, %s2960_s9 }
  0x69   : > { %2374 = vmatprep.subr.bf16.mxu1 %v2807_v9  ;;  %v2823_v25 = vld [vmem:[#allocation4 + $0xf0] sm:$0xff]   ;;  %v2827_v29 = vld [vmem:[#allocation4 + $0xf8] sm:$0xff]   ;;  %v177_v32 = vld [vmem:[#allocation2] sm:$0xf]  ;;  %p2958_p8 = pneg %p2957_p3  ;;  %p2963_p12 = scmp.lt.s32.totalorder %s2961_s4, %s2955_s29 }
  0x6a   : > { %v2824_v26 = vld [vmem:[#allocation4 + $0x30] sm:$0xff]   ;;  %v2828_v30 = vld [vmem:[#allocation4 + $0x38] sm:$0xff]   ;;  %v178_v33 = vld [vmem:[#allocation2 + $0x4] sm:$0xf] }
  0x6b   : > { %2287 = vmatpush3.bf16.msra.mxu0 %v2808_v10  ;;  %v2825_v27 = vld [vmem:[#allocation4 + $0xb0] sm:$0xff]   ;;  %v2829_v31 = vld [vmem:[#allocation4 + $0xb8] sm:$0xff]   ;;  %v179_v34 = vld [vmem:[#allocation2 + $0x8] sm:$0xf]  ;;  %v2088_v36 = vcombine.low %v177_v32, %v178_v33  ;;  %p2964_p0 = por %p2963_p12, %p2962_p10 }
  0x6c   : > { %2375 = vmatpush3.bf16.msra.mxu1 %v2809_v11  ;;  %2288 = vmatprep.subr.bf16.mxu0 %v2810_v12  ;;  %v180_v35 = vld [vmem:[#allocation2 + $0xc] sm:$0xf]  ;;  %v3210_v37 = vld [vmem:[#allocation2 + $0x10] sm:$0xf]  ;;  %v182_v38 = vld [vmem:[#allocation2 + $0x14] sm:$0xf] }
  0x6d   : > { %2376 = vmatprep.subr.bf16.mxu1 %v2811_v13  ;;  %v3212_v39 = vcombine.low %v179_v34, %v180_v35  ;;  %v3215_v40 = vcombine.low %v180_v35, %v3210_v37  ;;  %v202_v41 = vld [vmem:[#allocation2] sm:$0xe]  ;;  %v290_v42 = vshrl.u32 %v2088_v36, 16  ;;  %v292_v43 = vshll.u32 %v2088_v36, 16  ;;  %v183_v59 = vld [vmem:[#allocation2 + $0x18] sm:$0xf]  ;;  %p2965_p2 = pnand %p2964_p0, %p2958_p8 }
  0x6e   : > { %v3218_v44 = vcombine.low %v3210_v37, %v182_v38  ;;  %v2101_v45 = vcombine.low %v202_v41, %v178_v33  ;;  %v2835_v46 = vld [vmem:[#allocation4 + $0x140] sm:$0xff]   ;;  %v3228_v61 = vcombine.low %v182_v38, %v183_v59  ;;  %v2841_v63 = vld [vmem:[#allocation4 + $0x148] sm:$0xff]   ;;  %v2856_v34 = vld [vmem:[#allocation4 + $0x1d8] sm:$0xff]  }
  0x6f   : > { %2289 = vmatpush3.bf16.msra.mxu0 %v2812_v14  ;;  %v2836_v47 = vld [vmem:[#allocation4 + $0x1c0] sm:$0xff]   ;;  %v297_v48 = vshll.u32 %v3212_v39, 16  ;;  %1429 = vmatprep.mubr.bf16.mxu1 %v3215_v40  ;;  %v406_v49 = vrot.slane %v3212_v39, 1  ;;  %v294_v50 = vrot.slane %v292_v43, 1  ;;  %v301_v57 = vshrl.u32 %v3212_v39, 16  ;;  %v2842_v4 = vld [vmem:[#allocation4 + $0x1c8] sm:$0xff]  }
  0x70   : > { %2377 = vmatpush3.bf16.msra.mxu1 %v2813_v15  ;;  %2290 = vmatprep.subr.bf16.mxu0 %v2814_v16  ;;  %v405_v51 = vrot.slane %v2101_v45, 1  ;;  %v2837_v53 = vld [vmem:[#allocation4 + $0x100] sm:$0xff]   ;;  %v305_v58 = vshll.u32 %v3218_v44, 16  ;;  %v408_v62 = vrot.slane %v3218_v44, 1  ;;  %v2843_v6 = vld [vmem:[#allocation4 + $0x108] sm:$0xff]   ;;  %v309_v7 = vshrl.u32 %v3218_v44, 16 }
  0x71   : > { %2378 = vmatprep.subr.bf16.mxu1 %v2815_v17  ;;  %v299_v52 = vrot.slane %v297_v48, 1  ;;  %v2838_v54 = vld [vmem:[#allocation4 + $0x180] sm:$0xff]   ;;  %v295_v55 = vor.u32 %v294_v50, %v290_v42  ;;  %v2844_v8 = vld [vmem:[#allocation4 + $0x188] sm:$0xff]   ;;  %v2849_v16 = vld [vmem:[#allocation4 + $0x150] sm:$0xff]   ;;  %v476_v35 = vshrl.u32 %v3215_v40, 16  ;;  %v478_v38 = vshll.u32 %v3215_v40, 16 }
  0x72   : > { %v407_v56 = vsel %vm404_vm1, %v405_v51, %v406_v49  ;;  %v3226_v60 = vld [vmem:[#allocation2 + $0x1c] sm:$0xf]  ;;  %v307_v2 = vrot.slane %v305_v58, 1  ;;  %v185_v10 = vld [vmem:[#allocation2 + $0x20] sm:$0xf]  ;;  %v409_v12 = vsel %vm404_vm1, %v406_v49, %v408_v62  ;;  %v2858_v42 = vld [vmem:[#allocation4 + $0x198] sm:$0xff]  }
  0x73   : > { %2291 = vmatpush3.bf16.msra.mxu0 %v2816_v18  ;;  %v300_v0 = vsel %vm288_vm0, %v295_v55, %v299_v52  ;;  %v303_v1 = vor.u32 %v301_v57, %v299_v52  ;;  %v3233_v3 = vcombine.low %v183_v59, %v3226_v60  ;;  %v186_v11 = vld [vmem:[#allocation2 + $0x24] sm:$0xf]  ;;  %v3243_v15 = vcombine.low %v3226_v60, %v185_v10  ;;  %v3264_v43 = vld [vmem:[#allocation2 + $0x3c] sm:$0xf]  ;;  %v189_v45 = vld [vmem:[#allocation2 + $0x30] sm:$0xf] }
  0x74   : > { %2379 = vmatpush3.bf16.msra.mxu1 %v2817_v19  ;;  %2292 = vmatprep.subr.bf16.mxu0 %v2818_v20  ;;  %v311_v13 = vor.u32 %v309_v7, %v307_v2  ;;  %v3240_v14 = vcombine.low %v185_v10, %v186_v11  ;;  %v188_v19 = vld [vmem:[#allocation2 + $0x2c] sm:$0xf]  ;;  %v2863_v51 = vld [vmem:[#allocation4 + $0x160] sm:$0xff]  }
  0x75   : > { %2380 = vmatprep.subr.bf16.mxu1 %v2819_v21  ;;  %1308 = vmatprep.mubr.bf16.mxu0 %v300_v0  ;;  %v308_v5 = vsel %vm288_vm0, %v303_v1, %v307_v2  ;;  %v313_v9 = vshll.u32 %v3233_v3, 16  ;;  %v410_v18 = vrot.slane %v3233_v3, 1  ;;  %v317_v20 = vshrl.u32 %v3233_v3, 16  ;;  %v2850_v21 = vld [vmem:[#allocation4 + $0x1d0] sm:$0xff]   ;;  %v2864_v55 = vld [vmem:[#allocation4 + $0x1e0] sm:$0xff]  }
  0x76   : > { %v325_v41 = vshrl.u32 %v3240_v14, 16  ;;  %v3287_v58 = vcombine.low %v188_v19, %v189_v45  ;;  %v2866_v2 = vld [vmem:[#allocation4 + $0x1a0] sm:$0xff]  }
  0x77   : > { %2293 = vmatpush3.bf16.msra.mxu0 %v2820_v22  ;;  %v315_v17 = vrot.slane %v313_v9, 1 }
  0x78   : > { %2381 = vmatpush3.bf16.msra.mxu1 %v2821_v23  ;;  %2294 = vmatprep.subr.bf16.mxu0 %v2822_v24  ;;  %v321_v23 = vshll.u32 %v3240_v14, 16  ;;  %v2851_v24 = vld [vmem:[#allocation4 + $0x110] sm:$0xff]  }
  0x79   : > { %2382 = vmatprep.subr.bf16.mxu1 %v2823_v25  ;;  %v316_v22 = vsel %vm288_vm0, %v311_v13, %v315_v17  ;;  %v187_v25 = vld [vmem:[#allocation2 + $0x28] sm:$0xf] }
  0x7a   : > { %v323_v32 = vrot.slane %v321_v23, 1  ;;  %v3256_v33 = vcombine.low %v186_v11, %v187_v25  ;;  %v2871_v11 = vld [vmem:[#allocation4 + $0x128] sm:$0xff]   ;;  %v3313_v23 = vld [vmem:[#allocation2 + $0x5c] sm:$0xf] }
  0x7b   : > { %2295 = vmatpush3.bf16.msra.mxu0 %v2824_v26  ;;  %v2852_v26 = vld [vmem:[#allocation4 + $0x190] sm:$0xff]  }
  0x7c   : > { %2383 = vmatpush3.bf16.msra.mxu1 %v2825_v27  ;;  %2296 = vmatprep.subr.bf16.mxu0 %v2826_v28  ;;  %v2855_v27 = vld [vmem:[#allocation4 + $0x158] sm:$0xff]   ;;  %v3251_v28 = vcombine.low %v187_v25, %v188_v19  ;;  %v327_v57 = vor.u32 %v325_v41, %v323_v32  ;;  %v2877_v25 = vld [vmem:[#allocation4 + $0x170] sm:$0xff]  }
  0x7d   : > { %2384 = vmatprep.subr.bf16.mxu1 %v2827_v29  ;;  %v3253_v29 = vld [vmem:[#allocation2 + $0x34] sm:$0xf] }
  0x7e   : > { %v329_v49 = vshll.u32 %v3251_v28, 16  ;;  %v3274_v50 = vcombine.low %v189_v45, %v3253_v29  ;;  %v414_v0 = vrot.slane %v3251_v28, 1  ;;  %v2879_v45 = vld [vmem:[#allocation4 + $0x130] sm:$0xff]  }
  0x7f   : > { %2297 = vmatpush3.bf16.msra.mxu0 %v2828_v30  ;;  %v411_v30 = vsel %vm404_vm1, %v408_v62, %v410_v18  ;;  %v2865_v62 = vld [vmem:[#allocation4 + $0x120] sm:$0xff]  }
  0x80   : > { %2385 = vmatpush3.bf16.msra.mxu1 %v2829_v31  ;;  %2458 = vmatprep.subr.bf16.mxu0 %v2835_v46  ;;  %v319_v31 = vor.u32 %v317_v20, %v315_v17  ;;  %v191_v46 = vld [vmem:[#allocation2 + $0x38] sm:$0xf]  ;;  %v337_v1 = vshll.u32 %v3274_v50, 16  ;;  %v416_v10 = vrot.slane %v3274_v50, 1  ;;  %v341_v13 = vshrl.u32 %v3274_v50, 16  ;;  %v2872_v17 = vld [vmem:[#allocation4 + $0x1a8] sm:$0xff]  }
  0x81   : > { %2546 = vmatprep.subr.bf16.mxu1 %v2836_v47  ;;  %v3266_v47 = vld [vmem:[#allocation2 + $0x44] sm:$0xf]  ;;  %v3277_v52 = vcombine.low %v191_v46, %v3264_v43 }
  0x82   : > { %1309 = vmatmul.mubr.bf16.vlgmr.msra.gmra.mrb[0].mxu0 %v2088_v36  ;;  %v2857_v36 = vld [vmem:[#allocation4 + $0x118] sm:$0xff]   ;;  %v3269_v48 = vsel %vm288_vm0, %v319_v31, %v323_v32 }
  0x83   : > { %1430 = vmatmul.mubr.bf16.vlgmr.msra.gmra.mrb[0].mxu1 %v407_v56  ;;  %2459 = vmatpush3.bf16.msra.mxu0 %v2837_v53  ;;  %v3279_v53 = vld [vmem:[#allocation2 + $0x40] sm:$0xf]  ;;  %v418_v20 = vrot.slane %v3277_v52, 1  ;;  %v198_v31 = vld [vmem:[#allocation2 + $0x54] sm:$0xf] }
  0x84   : > { %2547 = vmatpush3.bf16.msra.mxu1 %v2838_v54  ;;  %1437 = vmatprep.mubr.bf16.mxu1 %v3228_v61  ;;  %v3281_v54 = vrot.slane %v478_v38, 1  ;;  %v3291_v59 = vcombine.low %v3279_v53, %v3266_v47  ;;  %v199_v32 = vld [vmem:[#allocation2 + $0x58] sm:$0xf]  ;;  %v2878_v38 = vld [vmem:[#allocation4 + $0x1f0] sm:$0xff]  }
  0x85   : > { %2548 = vmatprep.subr.bf16.mxu1 %v2842_v4  ;;  %1316 = vmatprep.mubr.bf16.mxu0 %v308_v5  ;;  %v345_v4 = vshll.u32 %v3277_v52, 16  ;;  %v2869_v5 = vld [vmem:[#allocation4 + $0x168] sm:$0xff]  }
  0x86   : > { %2460 = vmatprep.subr.bf16.mxu0 %v2841_v63  ;;  %v331_v63 = vrot.slane %v329_v49, 1  ;;  %v353_v7 = vshll.u32 %v3291_v59, 16 }
  0x87   : > { %2461 = vmatpush3.bf16.msra.mxu0 %v2843_v6  ;;  %v3297_v6 = vld [vmem:[#allocation2 + $0x4c] sm:$0xf]  ;;  %v347_v19 = vrot.slane %v345_v4, 1  ;;  %v203_v4 = vld [vmem:[#allocation2 + $0x60] sm:$0xf] }
  0x88   : > { %2549 = vmatpush3.bf16.msra.mxu1 %v2844_v8  ;;  %2462 = vmatprep.subr.bf16.mxu0 %v2849_v16  ;;  %v2870_v8 = vld [vmem:[#allocation4 + $0x1e8] sm:$0xff]   ;;  %v3301_v9 = vsel %vm288_vm0, %v327_v57, %v331_v63 }
  0x89   : > { %2550 = vmatprep.subr.bf16.mxu1 %v2850_v21  ;;  %v195_v16 = vld [vmem:[#allocation2 + $0x48] sm:$0xf]  ;;  %v349_v21 = vshrl.u32 %v3277_v52, 16 }
  0x8a   : > { %1317 = vmatmul.mubr.bf16.gmra.mrb[4].mxu0 %v3212_v39  ;;  %v3261_v39 = vrot.slane %v3240_v14, 1 }
  0x8b   : > { %1438 = vmatmul.mubr.bf16.gmra.mrb[4].mxu1 %v409_v12  ;;  %1323 = vmatprep.mubr.bf16.mxu0 %v316_v22  ;;  %v339_v12 = vrot.slane %v337_v1, 1  ;;  %v3311_v22 = vcombine.low %v195_v16, %v3297_v6  ;;  %v351_v49 = vor.u32 %v349_v21, %v347_v19 }
  0x8c   : > { %1444 = vmatprep.mubr.bf16.mxu1 %v3243_v15  ;;  %2463 = vmatpush3.bf16.msra.mxu0 %v2851_v24  ;;  %v413_v56 = vsel %vm404_vm1, %v410_v18, %v3261_v39  ;;  %v591_v18 = vrot.slane %v3228_v61, 1  ;;  %v355_v24 = vrot.slane %v353_v7, 1  ;;  %v3362_v7 = vcombine.low %v3266_v47, %v195_v16  ;;  %v204_v47 = vld [vmem:[#allocation2 + $0x64] sm:$0xf]  ;;  %v3375_v16 = vld [vmem:[#allocation4 + $0x200] sm:$0xff]  }
  0x8d   : > { %2551 = vmatpush3.bf16.msra.mxu1 %v2852_v26  ;;  %2464 = vmatprep.subr.bf16.mxu0 %v2855_v27  ;;  %v3318_v26 = vsel %vm404_vm1, %v3261_v39, %v414_v0  ;;  %v343_v41 = vor.u32 %v341_v13, %v339_v12 }
  0x8e   : > { %2552 = vmatprep.subr.bf16.mxu1 %v2856_v34  ;;  %3863 = vst [vmem:[#allocation18_spill] sm:$0xff] %v3318_v26  ;;  %v357_v34 = vshrl.u32 %v3291_v59, 16 }
  0x8f   : > { %v3350_v40 = vsel %vm288_vm0, %v343_v41, %v347_v19  ;;  %v3392_v41 = vcombine.low %v3313_v23, %v203_v4 }
  0x90   : > { %2465 = vmatpush3.bf16.msra.mxu0 %v2857_v36  ;;  %v3325_v36 = vcombine.low %v199_v32, %v3313_v23 }
  0x91   : > { %2553 = vmatpush3.bf16.msra.mxu1 %v2858_v42  ;;  %2466 = vmatprep.subr.bf16.mxu0 %v2863_v51  ;;  %v361_v42 = vshll.u32 %v3311_v22, 16  ;;  %v2880_v51 = vld [vmem:[#allocation4 + $0x1b0] sm:$0xff]  }
  0x92   : > { %1324 = vmatmul.mubr.bf16.gmra.mrb[8].mxu0 %v3218_v44  ;;  %v333_v44 = vshrl.u32 %v3251_v28, 16  ;;  %2554 = vmatprep.subr.bf16.mxu1 %v2864_v55  ;;  %v2882_v55 = vld [vmem:[#allocation4 + $0x178] sm:$0xff]   ;;  %v381_v19 = vshrl.u32 %v3325_v36, 16 }
  0x93   : > { %1445 = vmatmul.mubr.bf16.gmra.mrb[8].mxu1 %v411_v30  ;;  %1330 = vmatprep.mubr.bf16.mxu0 %v3269_v48  ;;  %v3321_v30 = vcombine.low %v3253_v29, %v191_v46  ;;  %v3845_v29 = vrot.slane %v3291_v59, 1  ;;  %v197_v46 = vld [vmem:[#allocation2 + $0x50] sm:$0xf] }
  0x94   : > { %1451 = vmatprep.mubr.bf16.mxu1 %v3256_v33  ;;  %2467 = vmatpush3.bf16.msra.mxu0 %v2865_v62  ;;  %v335_v27 = vor.u32 %v333_v44, %v331_v63  ;;  %v481_v62 = vor.u32 %v3281_v54, %v476_v35  ;;  %v3339_v63 = vsel %vm404_vm1, %v414_v0, %v416_v10  ;;  %v3355_v0 = vrot.slane %v361_v42, 1  ;;  %v208_v42 = vld [vmem:[#allocation2 + $0x6c] sm:$0xf] }
  0x95   : > { %2555 = vmatpush3.bf16.msra.mxu1 %v2866_v2  ;;  %2468 = vmatprep.subr.bf16.mxu0 %v2869_v5  ;;  %3864 = vst [vmem:[#allocation19_spill] sm:$0xff] %v3339_v63  ;;  %v3343_v44 = vcombine.low %v3264_v43, %v3279_v53  ;;  %v3345_v1 = vcombine.low %v197_v46, %v198_v31  ;;  %v377_v2 = vshll.u32 %v3325_v36, 16  ;;  %v2883_v5 = vld [vmem:[#allocation4 + $0x1f8] sm:$0xff]  }
  0x96   : > { %2556 = vmatprep.subr.bf16.mxu1 %v2870_v8  ;;  %v3332_v57 = vsel %vm288_vm0, %v335_v27, %v339_v12  ;;  %v3353_v35 = vsel %vm404_vm1, %v416_v10, %v418_v20  ;;  %v359_v54 = vor.u32 %v357_v34, %v355_v24  ;;  %v2884_v43 = vld [vmem:[#allocation4 + $0x138] sm:$0xff]   ;;  %v3359_v53 = vsel %vm288_vm0, %v351_v49, %v355_v24  ;;  %v205_v24 = vld [vmem:[#allocation2 + $0x68] sm:$0xf] }
  0x97   : > { %3865 = vst [vmem:[#allocation20_spill] sm:$0xff] %v3353_v35  ;;  %v3367_v8 = vsel %vm404_vm1, %v418_v20, %v3845_v29  ;;  %v2885_v10 = vld [vmem:[#allocation4 + $0x1b8] sm:$0xff]   ;;  %v3370_v12 = vcombine.low %v3297_v6, %v197_v46  ;;  %v3378_v20 = vrot.slane %v377_v2, 1  ;;  %v207_v6 = vld [vmem:[#allocation2 + $0xc] sm:$0xe]  ;;  %v593_v49 = vrot.slane %v3243_v15, 1 }
  0x98   : > { %2469 = vmatpush3.bf16.msra.mxu0 %v2871_v11  ;;  %3866 = vst [vmem:[#allocation21_spill] sm:$0xff] %v3367_v8  ;;  %v3387_v34 = vsel %vm288_vm0, %v359_v54, %v3355_v0  ;;  %v487_v46 = vshrl.u32 %v3228_v61, 16  ;;  %v499_v54 = vshll.u32 %v3256_v33, 16 }
  0x99   : > { %2557 = vmatpush3.bf16.msra.mxu1 %v2872_v17  ;;  %2470 = vmatprep.subr.bf16.mxu0 %v2877_v25  ;;  %v3380_v25 = vcombine.low %v203_v4, %v204_v47  ;;  %v3403_v23 = vor.u32 %v381_v19, %v3378_v20  ;;  %v3415_v4 = vcombine.low %v205_v24, %v208_v42  ;;  %v503_v19 = vshrl.u32 %v3256_v33, 16 }
  0x9a   : > { %1331 = vmatmul.mubr.bf16.gmra.mrb[12].mxu0 %v3233_v3  ;;  %2558 = vmatprep.subr.bf16.mxu1 %v2878_v38  ;;  %v3389_v38 = vcombine.low %v198_v31, %v199_v32  ;;  %v3405_v31 = vcombine.low %v204_v47, %v205_v24  ;;  %v595_v32 = vrot.slane %v3256_v33, 1  ;;  %v501_v47 = vrot.slane %v499_v54, 1 }
  0x9b   : > { %1452 = vmatmul.mubr.bf16.gmra.mrb[12].mxu1 %v413_v56  ;;  %1338 = vmatprep.mubr.bf16.mxu0 %v3301_v9  ;;  %v483_v56 = vshll.u32 %v3228_v61, 16  ;;  %v599_v42 = vrot.slane %v3321_v30, 1  ;;  %v515_v61 = vshll.u32 %v3321_v30, 16  ;;  %v527_v54 = vshrl.u32 %v3343_v44, 16 }
  0x9c   : > { %1459 = vmatprep.mubr.bf16.mxu1 %v3287_v58  ;;  %2471 = vmatpush3.bf16.msra.mxu0 %v2879_v45  ;;  %v2115_v45 = vcombine.low %v207_v6, %v3210_v37  ;;  %v3412_v37 = vsel %vm404_vm1, %v591_v18, %v593_v49  ;;  %v507_v6 = vshll.u32 %v3287_v58, 16  ;;  %v505_v33 = vor.u32 %v503_v19, %v501_v47 }
  0x9d   : > { %2559 = vmatpush3.bf16.msra.mxu1 %v2880_v51  ;;  %2472 = vmatprep.subr.bf16.mxu0 %v2882_v55  ;;  %v485_v11 = vrot.slane %v483_v56, 1  ;;  %v491_v51 = vshll.u32 %v3243_v15, 16  ;;  %v495_v55 = vshrl.u32 %v3243_v15, 16 }
  0x9e   : > { %2560 = vmatprep.subr.bf16.mxu1 %v2883_v5  ;;  %v590_v56 = vrot.slane %v2115_v45, 1  ;;  %v3418_v5 = vsel %vm404_vm1, %v593_v49, %v595_v32  ;;  %v511_v45 = vshrl.u32 %v3287_v58, 16  ;;  %v519_v49 = vshrl.u32 %v3321_v30, 16 }
  0x9f   : > { %v3383_v27 = vsel %vm288_vm0, %v481_v62, %v485_v11  ;;  %v489_v62 = vor.u32 %v487_v46, %v485_v11  ;;  %v493_v2 = vrot.slane %v491_v51, 1  ;;  %v509_v51 = vrot.slane %v507_v6, 1 }
  0xa0   : > { %2473 = vmatpush3.bf16.msra.mxu0 %v2884_v43  ;;  %v597_v43 = vrot.slane %v3287_v58, 1  ;;  %v3426_v15 = vsel %vm404_vm1, %v590_v56, %v591_v18  ;;  %v601_v18 = vrot.slane %v3343_v44, 1  ;;  %v523_v58 = vshll.u32 %v3343_v44, 16 }
  0xa1   : > { %2561 = vmatpush3.bf16.msra.mxu1 %v2885_v10  ;;  %2654 = vmatprep.subr.bf16.mxu0 %v3375_v16  ;;  %v3429_v10 = vsel %vm288_vm0, %v489_v62, %v493_v2  ;;  %v497_v11 = vor.u32 %v495_v55, %v493_v2  ;;  %v517_v55 = vrot.slane %v515_v61, 1  ;;  %v603_v62 = vrot.slane %v3362_v7, 1 }
  0xa2   : > { %1339 = vmatmul.mubr.bf16.gmra.mrb[16].mxu0 %v3240_v14  ;;  %2694 = vmatprep.subr.bf16.mxu1 %v3375_v16  ;;  %v3433_v24 = vsel %vm404_vm1, %v595_v32, %v597_v43  ;;  %v3445_v32 = vsel %vm404_vm1, %v597_v43, %v599_v42  ;;  %v3449_v56 = vsel %vm404_vm1, %v599_v42, %v601_v18  ;;  %v531_v43 = vshll.u32 %v3362_v7, 16 }
  0xa3   : > { %1460 = vmatmul.mubr.bf16.gmra.mrb[16].mxu1 %v3318_v26  ;;  %1345 = vmatprep.mubr.bf16.mxu0 %v3332_v57  ;;  %v3442_v46 = vsel %vm288_vm0, %v497_v11, %v501_v47  ;;  %v513_v2 = vor.u32 %v511_v45, %v509_v51  ;;  %v521_v11 = vor.u32 %v519_v49, %v517_v55  ;;  %v525_v19 = vrot.slane %v523_v58, 1 }
  0xa4   : > { %1466 = vmatprep.mubr.bf16.mxu1 %v3321_v30  ;;  %v3455_v30 = vsel %vm288_vm0, %v505_v33, %v509_v51  ;;  %v3460_v47 = vsel %vm404_vm1, %v601_v18, %v603_v62  ;;  %v605_v6 = vrot.slane %v3370_v12, 1  ;;  %v533_v61 = vrot.slane %v531_v43, 1 }
  0xa5   : > { %v3465_v42 = vsel %vm288_vm0, %v513_v2, %v517_v55  ;;  %v535_v33 = vshrl.u32 %v3362_v7, 16  ;;  %v539_v45 = vshll.u32 %v3370_v12, 16  ;;  %v529_v49 = vor.u32 %v527_v54, %v525_v19 }
  0xa6   : > { %v3474_v18 = vsel %vm404_vm1, %v603_v62, %v605_v6  ;;  %v607_v51 = vrot.slane %v3389_v38, 1  ;;  %v643_v55 = vshll.u32 %v3380_v25, 16  ;;  %v543_v2 = vshrl.u32 %v3370_v12, 16 }
  0xa7   : > { %v537_v58 = vor.u32 %v535_v33, %v533_v61  ;;  %v541_v21 = vrot.slane %v539_v45, 1  ;;  %v609_v54 = vrot.slane %v3392_v41, 1  ;;  %v647_v45 = vshrl.u32 %v3380_v25, 16 }
  0xa8   : > { %v3483_v43 = vsel %vm404_vm1, %v605_v6, %v607_v51  ;;  %v651_v6 = vshll.u32 %v3415_v4, 16 }
  0xa9   : > { %v3488_v62 = vsel %vm288_vm0, %v537_v58, %v541_v21  ;;  %v545_v33 = vor.u32 %v543_v2, %v541_v21  ;;  %v555_v21 = vshll.u32 %v3392_v41, 16  ;;  %v3846_v2 = vrot.slane %v3405_v31, 1 }
  0xaa   : > { %1346 = vmatmul.mubr.bf16.gmra.mrb[20].mxu0 %v3251_v28 }
  0xab   : > { %1467 = vmatmul.mubr.bf16.gmra.mrb[20].mxu1 %v3339_v63  ;;  %1352 = vmatprep.mubr.bf16.mxu0 %v3350_v40  ;;  %v557_v13 = vrot.slane %v555_v21, 1 }
  0xac   : > { %1473 = vmatprep.mubr.bf16.mxu1 %v3343_v44  ;;  %v3471_v44 = vsel %vm288_vm0, %v521_v11, %v525_v19  ;;  %v547_v11 = vshll.u32 %v3389_v38, 16  ;;  %v645_v19 = vrot.slane %v643_v55, 1 }
  0xae   : > { %v549_v17 = vrot.slane %v547_v11, 1  ;;  %v3500_v58 = vsel %vm288_vm0, %v3403_v23, %v645_v19  ;;  %v649_v55 = vor.u32 %v647_v45, %v645_v19  ;;  %v559_v19 = vshrl.u32 %v3392_v41, 16 }
  0xaf   : > { %v3867_v45 = vrot.slane %v3311_v22, 1 }
  0xb0   : > { %v3505_v11 = vsel %vm288_vm0, %v545_v33, %v549_v17  ;;  %v3868_v33 = vrot.slane %v3291_v59, 1  ;;  %v561_v26 = vor.u32 %v559_v19, %v557_v13  ;;  %v3871_v19 = vrot.slane %v3311_v22, 1 }
  0xb2   : > { %1353 = vmatmul.mubr.bf16.gmra.mrb[24].mxu0 %v3274_v50 }
  0xb3   : > { %1474 = vmatmul.mubr.bf16.gmra.mrb[24].mxu1 %v3353_v35  ;;  %1360 = vmatprep.mubr.bf16.mxu0 %v3359_v53 }
  0xb4   : > { %1481 = vmatprep.mubr.bf16.mxu1 %v3362_v7  ;;  %v3480_v7 = vsel %vm288_vm0, %v529_v49, %v533_v61  ;;  %v3493_v61 = vsel %vm404_vm1, %v607_v51, %v609_v54  ;;  %v551_v49 = vshrl.u32 %v3389_v38, 16  ;;  %v3507_v51 = vrot.slane %v651_v6, 1 }
  0xb5   : > { %v3522_v6 = vsel %vm404_vm1, %v3868_v33, %v3867_v45  ;;  %v3061_v33 = vmov 0  }
  0xb6   : > { %v553_v29 = vor.u32 %v551_v49, %v549_v17  ;;  %v3869_v17 = vshrl.u32 %v3311_v22, 16  ;;  %v3529_v21 = vsel %vm288_vm0, %v649_v55, %v3507_v51  ;;  %176 = vst [vmem:[#allocation2 + $0x78] sm:$0x1] %v3061_v33 }
  0xb8   : > { %v367_v49 = vor.u32 %v3869_v17, %v3355_v0  ;;  %v3535_v63 = vsel %vm288_vm0, %v553_v29, %v557_v13  ;;  %v424_v29 = vrot.slane %v3345_v1, 1 }
  0xba   : > { %1361 = vmatmul.mubr.bf16.gmra.mrb[28].mxu0 %v3277_v52 }
  0xbb   : > { %1482 = vmatmul.mubr.bf16.gmra.mrb[28].mxu1 %v3367_v8  ;;  %1367 = vmatprep.mubr.bf16.mxu0 %v3387_v34  ;;  %v3870_v8 = vshll.u32 %v3345_v1, 16 }
  0xbc   : > { %1488 = vmatprep.mubr.bf16.mxu1 %v3370_v12  ;;  %v3513_v12 = vsel %vm404_vm1, %v609_v54, %v3846_v2  ;;  %v563_v54 = vshll.u32 %v3405_v31, 16  ;;  %v212_v2 = vld [vmem:[#allocation2 + $0x18] sm:$0xe] }
  0xbd   : > { %v371_v35 = vrot.slane %v3870_v8, 1  ;;  %v2120_v0 = vcombine.low %v212_v2, %v3226_v60  ;;  %v373_v8 = vshrl.u32 %v3345_v1, 16  ;;  %v680_v2 = vrot.slane %v3380_v25, 1 }
  0xbe   : > { %v3537_v45 = vrot.slane %v563_v54, 1  ;;  %v2886_v54 = vld [vmem:[#allocation2 + $0x60] ss:$0 sps:$4 sm:$0x11]  }
  0xbf   : > { %v3546_v17 = vsel %vm288_vm0, %v367_v49, %v371_v35  ;;  %v678_v13 = vrot.slane %v2120_v0, 1  ;;  %v375_v49 = vor.u32 %v373_v8, %v371_v35 }
  0xc0   : > { %v3543_v55 = vsel %vm288_vm0, %v561_v26, %v3537_v45  ;;  %v426_v26 = vrot.slane %v3325_v36, 1 }
  0xc1   : > { %v3554_v60 = vsel %vm404_vm1, %v678_v13, %v3261_v39  ;;  %v682_v39 = vrot.slane %v3415_v4, 1  ;;  %v3571_v0 = vsel %vm288_vm0, %v375_v49, %v3378_v20  ;;  %v385_v13 = vshll.u32 %v2886_v54, 16 }
  0xc2   : > { %1368 = vmatmul.mubr.bf16.gmra.mrb[32].mxu0 %v3291_v59  ;;  %v3565_v33 = vsel %vm404_vm1, %v426_v26, %v680_v2  ;;  %v3582_v35 = vsel %vm404_vm1, %v424_v29, %v426_v26 }
  0xc3   : > { %1489 = vmatmul.mubr.bf16.gmra.mrb[32].mxu1 %v3522_v6  ;;  %1374 = vmatprep.mubr.bf16.mxu0 %v3546_v17  ;;  %v387_v8 = vrot.slane %v385_v13, 1 }
  0xc4   : > { %1495 = vmatprep.mubr.bf16.mxu1 %v3389_v38  ;;  %v3562_v38 = vsel %vm404_vm1, %v3871_v19, %v424_v29  ;;  %v3577_v19 = vsel %vm404_vm1, %v680_v2, %v682_v39  ;;  %v2892_v29 = vld [vmem:[#allocation4 + $0x208] sm:$0xff]  }
  0xc5   : > { %v388_v20 = vsel %vm288_vm0, %v3403_v23, %v387_v8  ;;  %v2893_v23 = vld [vmem:[#allocation4 + $0x210] sm:$0xff]  }
  0xca   : > { %1375 = vmatmul.mubr.bf16.gmra.mrb[36].mxu0 %v3311_v22 }
  0xcb   : > { %1496 = vmatmul.mubr.bf16.gmra.mrb[36].mxu1 %v3562_v38  ;;  %1382 = vmatprep.mubr.bf16.mxu0 %v3571_v0 }
  0xcc   : > { %1503 = vmatprep.mubr.bf16.mxu1 %v3392_v41  ;;  %v428_v41 = vrot.slane %v2886_v54, 1 }
  0xce   : > { %v429_v2 = vsel %vm404_vm1, %v426_v26, %v428_v41 }
  0xd2   : > { %1383 = vmatmul.mubr.bf16.gmra.mrb[40].mxu0 %v3345_v1 }
  0xd3   : > { %1504 = vmatmul.mubr.bf16.gmra.mrb[40].mxu1 %v3582_v35  ;;  %1389 = vmatprep.mubr.bf16.mxu0 %v388_v20 }
  0xd4   : > { %1510 = vmatprep.mubr.bf16.mxu1 %v3405_v31 }
  0xda   : > { %1390 = vmatmul.mubr.bf16.gmra.mrb[44].mxu0 %v3325_v36 }
  0xdb   : > { %1511 = vmatmul.mubr.bf16.gmra.mrb[44].mxu1 %v429_v2  ;;  %1550 = vmatprep.mubr.bf16.mxu0 %v3426_v15  ;;  %v567_v15 = vshrl.u32 %v3405_v31, 16 }
  0xdc   : > { %1671 = vmatprep.mubr.bf16.mxu1 %v3269_v48  ;;  %v2894_v48 = vld [vmem:[#allocation4 + $0x218] sm:$0xff]  }
  0xe2   : > { %1551 = vmatmul.mubr.bf16.vlgmr.msra.gmra.mrb[48].mxu0 %v3383_v27  ;;  %v2900_v27 = vld [vmem:[#allocation2 + $0x6c] ss:$0 sps:$4 sm:$0x11]  }
  0xe3   : > { %1672 = vmatmul.mubr.bf16.vlgmr.msra.gmra.mrb[48].mxu1 %v3233_v3  ;;  %2655 = vmatpush3.bf16.msra.mxu0 %v3375_v16  ;;  %v2895_v3 = vld [vmem:[#allocation4 + $0x220] sm:$0xff]  }
  0xe4   : > { %2702 = vmatpush3.bf16.msra.mxu1 %v3375_v16  ;;  %1679 = vmatprep.mubr.bf16.mxu1 %v3301_v9  ;;  %v2896_v9 = vld [vmem:[#allocation4 + $0x228] sm:$0xff]  }
  0xe5   : > { %2695 = vmatprep.subr.bf16.mxu1 %v2892_v29  ;;  %1558 = vmatprep.mubr.bf16.mxu0 %v3412_v37  ;;  %v613_v37 = vrot.slane %v2900_v27, 1 }
  0xe6   : > { %2656 = vmatprep.subr.bf16.mxu0 %v2892_v29 }
  0xe7   : > { %2657 = vmatpush3.bf16.msra.mxu0 %v2892_v29 }
  0xe8   : > { %2703 = vmatpush3.bf16.msra.mxu1 %v2892_v29  ;;  %2658 = vmatprep.subr.bf16.mxu0 %v2893_v23 }
  0xe9   : > { %2696 = vmatprep.subr.bf16.mxu1 %v2893_v23 }
  0xea   : > { %1559 = vmatmul.mubr.bf16.gmra.mrb[52].mxu0 %v3429_v10  ;;  %v571_v10 = vshll.u32 %v2900_v27, 16 }
  0xeb   : > { %1680 = vmatmul.mubr.bf16.gmra.mrb[52].mxu1 %v3240_v14  ;;  %1565 = vmatprep.mubr.bf16.mxu0 %v3418_v5  ;;  %v2897_v14 = vld [vmem:[#allocation4 + $0x230] sm:$0xff]  }
  0xec   : > { %1686 = vmatprep.mubr.bf16.mxu1 %v3332_v57  ;;  %2704 = vmatpush3.bf16.msra.mxu1 %v2893_v23  ;;  %v2899_v57 = vld [vmem:[#allocation4 + $0x238] sm:$0xff]  }
  0xed   : > { %2697 = vmatprep.subr.bf16.mxu1 %v2894_v48  ;;  %2659 = vmatpush3.bf16.msra.mxu0 %v2893_v23 }
  0xee   : > { %2660 = vmatprep.subr.bf16.mxu0 %v2894_v48 }
  0xf0   : > { %2705 = vmatpush3.bf16.msra.mxu1 %v2894_v48 }
  0xf1   : > { %2698 = vmatprep.subr.bf16.mxu1 %v2895_v3  ;;  %2661 = vmatpush3.bf16.msra.mxu0 %v2894_v48 }
  0xf2   : > { %2662 = vmatprep.subr.bf16.mxu0 %v2895_v3  ;;  %1566 = vmatmul.mubr.bf16.gmra.mrb[56].mxu0 %v3442_v46  ;;  %v573_v46 = vrot.slane %v571_v10, 1 }
  0xf3   : > { %1687 = vmatmul.mubr.bf16.gmra.mrb[56].mxu1 %v3251_v28  ;;  %1572 = vmatprep.mubr.bf16.mxu0 %v3433_v24  ;;  %v2898_v28 = vld [vmem:[#allocation2 + $0x70] sm:$0xff]   ;;  %v3872_v24 = vrot.slane %v3405_v31, 1 }
  0xf4   : > { %1693 = vmatprep.mubr.bf16.mxu1 %v3350_v40  ;;  %2706 = vmatpush3.bf16.msra.mxu1 %v2895_v3  ;;  %v2901_v40 = vld [vmem:[#allocation2 + $0x78] ss:$0 sps:$4 sm:$0x11]   ;;  %v684_v31 = vrot.slane %v2898_v28, 1 }
  0xf5   : > { %2699 = vmatprep.subr.bf16.mxu1 %v2896_v9  ;;  %2663 = vmatpush3.bf16.msra.mxu0 %v2895_v3  ;;  %v667_v16 = vshll.u32 %v2901_v40, 16 }
  0xf6   : > { %2664 = vmatprep.subr.bf16.mxu0 %v2896_v9 }
  0xf8   : > { %2707 = vmatpush3.bf16.msra.mxu1 %v2896_v9 }
  0xf9   : > { %2700 = vmatprep.subr.bf16.mxu1 %v2897_v14  ;;  %2665 = vmatpush3.bf16.msra.mxu0 %v2896_v9 }
  0xfa   : > { %2666 = vmatprep.subr.bf16.mxu0 %v2897_v14  ;;  %1573 = vmatmul.mubr.bf16.gmra.mrb[60].mxu0 %v3455_v30  ;;  %v3874_v30 = vld [vmem:[#allocation19_spill] sm:$0xff] }
  0xfb   : > { %1694 = vmatmul.mubr.bf16.gmra.mrb[60].mxu1 %v3274_v50  ;;  %1580 = vmatprep.mubr.bf16.mxu0 %v3445_v32  ;;  %v655_v50 = vshrl.u32 %v3415_v4, 16 }
  0xfc   : > { %1701 = vmatprep.mubr.bf16.mxu1 %v3359_v53  ;;  %2708 = vmatpush3.bf16.msra.mxu1 %v2897_v14  ;;  %v663_v53 = vshrl.u32 %v2898_v28, 16 }
  0xfd   : > { %2701 = vmatprep.subr.bf16.mxu1 %v2899_v57  ;;  %2667 = vmatpush3.bf16.msra.mxu0 %v2897_v14 }
  0xfe   : > { %2668 = vmatprep.subr.bf16.mxu0 %v2899_v57 }
 0x100   : > { %2709 = vmatpush3.bf16.msra.mxu1 %v2899_v57 }
 0x101   : > { %2669 = vmatpush3.bf16.msra.mxu0 %v2899_v57 }
 0x102   : > { %1581 = vmatmul.mubr.bf16.gmra.mrb[64].mxu0 %v3465_v42  ;;  %v686_v42 = vrot.slane %v2901_v40, 1 }
 0x103   : > { %1702 = vmatmul.mubr.bf16.gmra.mrb[64].mxu1 %v3277_v52  ;;  %1587 = vmatprep.mubr.bf16.mxu0 %v3449_v56  ;;  %v659_v52 = vshll.u32 %v2898_v28, 16  ;;  %v3873_v56 = vld [vmem:[#allocation18_spill] sm:$0xff] }
 0x104   : > { %1708 = vmatprep.mubr.bf16.mxu1 %v3387_v34 }
 0x10a   : > { %1588 = vmatmul.mubr.bf16.gmra.mrb[68].mxu0 %v3471_v44  ;;  %v3875_v44 = vld [vmem:[#allocation20_spill] sm:$0xff] }
 0x10b   : > { %1709 = vmatmul.mubr.bf16.gmra.mrb[68].mxu1 %v3291_v59  ;;  %1594 = vmatprep.mubr.bf16.mxu0 %v3460_v47  ;;  %v657_v59 = vor.u32 %v655_v50, %v3507_v51  ;;  %v685_v47 = vsel %vm404_vm1, %v682_v39, %v684_v31  ;;  %v3663_v51 = vld [vmem:[%s3836_s2] ss:$0 sm:$0xff] }
 0x10c   : > { %1715 = vmatprep.mubr.bf16.mxu1 %v3546_v17 }
 0x112   : > { %1595 = vmatmul.mubr.bf16.gmra.mrb[72].mxu0 %v3480_v7  ;;  %v687_v7 = vsel %vm404_vm1, %v684_v31, %v686_v42 }
 0x113   : > { %1716 = vmatmul.mubr.bf16.gmra.mrb[72].mxu1 %v3311_v22  ;;  %1602 = vmatprep.mubr.bf16.mxu0 %v3474_v18  ;;  %v661_v22 = vrot.slane %v659_v52, 1  ;;  %v3876_v18 = vld [vmem:[#allocation21_spill] sm:$0xff] }
 0x114   : > { %1723 = vmatprep.mubr.bf16.mxu1 %v3571_v0 }
 0x115   : > { %v665_v34 = vor.u32 %v663_v53, %v661_v22 }
 0x11a   : > { %1603 = vmatmul.mubr.bf16.gmra.mrb[76].mxu0 %v3488_v62 }
 0x11b   : > { %1724 = vmatmul.mubr.bf16.gmra.mrb[76].mxu1 %v3345_v1  ;;  %1609 = vmatprep.mubr.bf16.mxu0 %v3483_v43  ;;  %v662_v1 = vsel %vm288_vm0, %v657_v59, %v661_v22 }
 0x11c   : > { %1730 = vmatprep.mubr.bf16.mxu1 %v3500_v58 }
 0x122   : > { %1610 = vmatmul.mubr.bf16.gmra.mrb[80].mxu0 %v3505_v11 }
 0x123   : > { %1731 = vmatmul.mubr.bf16.gmra.mrb[80].mxu1 %v3325_v36  ;;  %1616 = vmatprep.mubr.bf16.mxu0 %v3493_v61  ;;  %v669_v36 = vrot.slane %v667_v16, 1 }
 0x124   : > { %1737 = vmatprep.mubr.bf16.mxu1 %v3529_v21 }
 0x125   : > { %v670_v5 = vsel %vm288_vm0, %v665_v34, %v669_v36 }
 0x12a   : > { %1617 = vmatmul.mubr.bf16.gmra.mrb[84].mxu0 %v3535_v63  ;;  %v569_v63 = vor.u32 %v567_v15, %v3537_v45 }
 0x12b   : > { %1738 = vmatmul.mubr.bf16.gmra.mrb[84].mxu1 %v3380_v25  ;;  %1624 = vmatprep.mubr.bf16.mxu0 %v3513_v12  ;;  %v614_v25 = vsel %vm404_vm1, %v3872_v24, %v613_v37 }
 0x12c   : > { %1745 = vmatprep.mubr.bf16.mxu1 %v662_v1  ;;  %v574_v32 = vsel %vm288_vm0, %v569_v63, %v573_v46 }
 0x132   : > { %1625 = vmatmul.mubr.bf16.gmra.mrb[88].mxu0 %v3543_v55 }
 0x133   : > { %1746 = vmatmul.mubr.bf16.gmra.mrb[88].mxu1 %v3415_v4  ;;  %1631 = vmatprep.mubr.bf16.mxu0 %v614_v25 }
 0x134   : > { %1752 = vmatprep.mubr.bf16.mxu1 %v670_v5 }
 0x13a   : > { %1632 = vmatmul.mubr.bf16.gmra.mrb[92].mxu0 %v574_v32 }
 0x13b   : > { %1753 = vmatmul.mubr.bf16.gmra.mrb[92].mxu1 %v2898_v28  ;;  %2670 = vmatprep.mubr.bf16.mxu0 %v3554_v60 }
 0x13c   : > { %2682 = vmatprep.mubr.bf16.mxu1 %v3562_v38 }
 0x142   : > { %2671 = vmatmul.mubr.bf16.vlgmr.msra.gmra.mrb[96].mxu0 %v3873_v56 }
 0x143   : > { %2683 = vmatmul.mubr.bf16.vlgmr.msra.gmra.mrb[96].mxu1 %v3582_v35  ;;  %2674 = vmatprep.mubr.bf16.mxu0 %v3874_v30 }
 0x144   : > { %2686 = vmatprep.mubr.bf16.mxu1 %v3565_v33 }
 0x14a   : > { %2675 = vmatmul.mubr.bf16.gmra.mrb[100].mxu0 %v3875_v44 }
 0x14b   : > { %2687 = vmatmul.mubr.bf16.gmra.mrb[100].mxu1 %v3577_v19  ;;  %2678 = vmatprep.mubr.bf16.mxu0 %v3876_v18 }
 0x14c   : > { %2690 = vmatprep.mubr.bf16.mxu1 %v685_v47 }
 0x152   : > { %2679 = vmatmul.mubr.bf16.gmra.mrb[104].mxu0 %v3522_v6 }
 0x153   : > { %2691 = vmatmul.mubr.bf16.gmra.mrb[104].mxu1 %v687_v7 }
 0x155   : > { %v2298_v4 = vpop.f32.mrb[0].mxu0 }
 0x156   : > { %v2386_v43 = vpop.f32.mrb[0].mxu1  ;;  %v2299_v12 = vpop.f32.mrb[1].mxu0 }
 0x157   : > { %v2387_v62 = vpop.f32.mrb[1].mxu1  ;;  %v2300_v45 = vadd.f32 %v2299_v12, %v2298_v4  ;;  %v2301_v55 = vpop.f32.mrb[2].mxu0 }
 0x158   : > { %v2388_v61 = vadd.f32 %v2387_v62, %v2386_v43  ;;  %v2389_v58 = vpop.f32.mrb[2].mxu1  ;;  %v2302_v17 = vpop.f32.mrb[3].mxu0 }
 0x159   : > { %v2390_v11 = vpop.f32.mrb[3].mxu1  ;;  %v1311_v60 = vadd.f32 %v2300_v45, %v3663_v51  ;;  %v2303_v26 = vadd.f32 %v2302_v17, %v2301_v55 }
 0x15a   : > { %v2391_v21 = vadd.f32 %v2390_v11, %v2389_v58 }
 0x15b   : > { %v3666_v38 = vadd.f32 %v2388_v61, %v1311_v60  ;;  %v1314_v49 = vadd.f32 %v2303_v26, %v3663_v51 }
 0x15d   : > { %v3669_v39 = vadd.f32 %v2391_v21, %v1314_v49  ;;  %v2304_v0 = vpop.f32.mrb[4].mxu0 }
 0x15e   : > { %v2392_v6 = vpop.f32.mrb[4].mxu1  ;;  %v2305_v19 = vpop.f32.mrb[5].mxu0 }
 0x15f   : > { %v2393_v54 = vpop.f32.mrb[5].mxu1  ;;  %v2307_v8 = vpop.f32.mrb[6].mxu0 }
 0x160   : > { %v2395_v33 = vpop.f32.mrb[6].mxu1  ;;  %v2308_v20 = vpop.f32.mrb[7].mxu0 }
 0x161   : > { %v2396_v13 = vpop.f32.mrb[7].mxu1  ;;  %v2309_v41 = vadd.f32 %v2308_v20, %v2307_v8 }
 0x162   : > { %v2397_v35 = vadd.f32 %v2396_v13, %v2395_v33 }
 0x163   : > { %v1321_v29 = vadd.f32 %v2309_v41, %v3663_v51 }
 0x165   : > { %v3672_v9 = vadd.f32 %v2397_v35, %v1321_v29  ;;  %v2310_v14 = vpop.f32.mrb[8].mxu0 }
 0x166   : > { %v2398_v2 = vpop.f32.mrb[8].mxu1  ;;  %v2311_v28 = vpop.f32.mrb[9].mxu0 }
 0x167   : > { %v2399_v23 = vpop.f32.mrb[9].mxu1  ;;  %v2312_v50 = vadd.f32 %v2311_v28, %v2310_v14  ;;  %v2313_v52 = vpop.f32.mrb[10].mxu0 }
 0x168   : > { %v2400_v48 = vadd.f32 %v2399_v23, %v2398_v2  ;;  %v2401_v3 = vpop.f32.mrb[10].mxu1  ;;  %v2314_v59 = vpop.f32.mrb[11].mxu0 }
 0x169   : > { %v2402_v57 = vpop.f32.mrb[11].mxu1  ;;  %v1326_v22 = vadd.f32 %v2312_v50, %v3663_v51 }
 0x16b   : > { %v3675_v1 = vadd.f32 %v2400_v48, %v1326_v22 }
 0x16d   : > { %v2316_v34 = vpop.f32.mrb[12].mxu0 }
 0x16e   : > { %v2404_v40 = vpop.f32.mrb[12].mxu1  ;;  %v2317_v37 = vpop.f32.mrb[13].mxu0 }
 0x16f   : > { %v2405_v53 = vpop.f32.mrb[13].mxu1  ;;  %v2318_v15 = vadd.f32 %v2317_v37, %v2316_v34  ;;  %v2319_v10 = vpop.f32.mrb[14].mxu0 }
 0x170   : > { %v2406_v16 = vadd.f32 %v2405_v53, %v2404_v40  ;;  %v2407_v27 = vpop.f32.mrb[14].mxu1  ;;  %v2320_v24 = vpop.f32.mrb[15].mxu0 }
 0x171   : > { %v2408_v36 = vpop.f32.mrb[15].mxu1  ;;  %v1333_v25 = vadd.f32 %v2318_v15, %v3663_v51  ;;  %v2321_v63 = vadd.f32 %v2320_v24, %v2319_v10 }
 0x172   : > { %v2409_v5 = vadd.f32 %v2408_v36, %v2407_v27 }
 0x173   : > { %v3678_v32 = vadd.f32 %v2406_v16, %v1333_v25  ;;  %v1336_v31 = vadd.f32 %v2321_v63, %v3663_v51 }
 0x175   : > { %v3681_v47 = vadd.f32 %v2409_v5, %v1336_v31  ;;  %v2322_v42 = vpop.f32.mrb[16].mxu0 }
 0x176   : > { %v2410_v46 = vpop.f32.mrb[16].mxu1  ;;  %v2323_v18 = vpop.f32.mrb[17].mxu0 }
 0x177   : > { %v2411_v56 = vpop.f32.mrb[17].mxu1  ;;  %v2325_v43 = vpop.f32.mrb[18].mxu0 }
 0x178   : > { %v2413_v30 = vpop.f32.mrb[18].mxu1  ;;  %v2326_v62 = vpop.f32.mrb[19].mxu0 }
 0x179   : > { %v2414_v44 = vpop.f32.mrb[19].mxu1  ;;  %v2327_v61 = vadd.f32 %v2326_v62, %v2325_v43 }
 0x17a   : > { %v2415_v7 = vadd.f32 %v2414_v44, %v2413_v30 }
 0x17b   : > { %v1343_v4 = vadd.f32 %v2327_v61, %v3663_v51 }
 0x17d   : > { %v3684_v45 = vadd.f32 %v2415_v7, %v1343_v4  ;;  %v2328_v55 = vpop.f32.mrb[20].mxu0 }
 0x17e   : > { %v2416_v58 = vpop.f32.mrb[20].mxu1  ;;  %v2329_v60 = vpop.f32.mrb[21].mxu0 }
 0x17f   : > { %v2417_v11 = vpop.f32.mrb[21].mxu1  ;;  %v2330_v26 = vadd.f32 %v2329_v60, %v2328_v55  ;;  %v2331_v6 = vpop.f32.mrb[22].mxu0 }
 0x180   : > { %v2418_v12 = vadd.f32 %v2417_v11, %v2416_v58  ;;  %v2419_v21 = vpop.f32.mrb[22].mxu1  ;;  %v2332_v49 = vpop.f32.mrb[23].mxu0 }
 0x181   : > { %v2420_v17 = vpop.f32.mrb[23].mxu1  ;;  %v1348_v54 = vadd.f32 %v2330_v26, %v3663_v51 }
 0x183   : > { %v3687_v0 = vadd.f32 %v2418_v12, %v1348_v54 }
 0x185   : > { %v2334_v8 = vpop.f32.mrb[24].mxu0 }
 0x186   : > { %v2422_v33 = vpop.f32.mrb[24].mxu1  ;;  %v2335_v41 = vpop.f32.mrb[25].mxu0 }
 0x187   : > { %v2423_v13 = vpop.f32.mrb[25].mxu1  ;;  %v2336_v29 = vadd.f32 %v2335_v41, %v2334_v8  ;;  %v2337_v23 = vpop.f32.mrb[26].mxu0 }
 0x188   : > { %v2424_v19 = vadd.f32 %v2423_v13, %v2422_v33  ;;  %v2425_v35 = vpop.f32.mrb[26].mxu1  ;;  %v2338_v48 = vpop.f32.mrb[27].mxu0 }
 0x189   : > { %v2426_v20 = vpop.f32.mrb[27].mxu1  ;;  %v1355_v3 = vadd.f32 %v2336_v29, %v3663_v51  ;;  %v2339_v14 = vadd.f32 %v2338_v48, %v2337_v23 }
 0x18a   : > { %v2427_v2 = vadd.f32 %v2426_v20, %v2425_v35 }
 0x18b   : > { %v3690_v28 = vadd.f32 %v2424_v19, %v1355_v3  ;;  %v1358_v50 = vadd.f32 %v2339_v14, %v3663_v51 }
 0x18d   : > { %v3693_v22 = vadd.f32 %v2427_v2, %v1358_v50  ;;  %v2340_v40 = vpop.f32.mrb[28].mxu0 }
 0x18e   : > { %v2428_v57 = vpop.f32.mrb[28].mxu1  ;;  %v2341_v16 = vpop.f32.mrb[29].mxu0 }
 0x18f   : > { %v2429_v52 = vpop.f32.mrb[29].mxu1  ;;  %v2343_v34 = vpop.f32.mrb[30].mxu0 }
 0x190   : > { %v2431_v59 = vpop.f32.mrb[30].mxu1  ;;  %v2344_v36 = vpop.f32.mrb[31].mxu0 }
 0x191   : > { %v2432_v53 = vpop.f32.mrb[31].mxu1  ;;  %v2345_v37 = vadd.f32 %v2344_v36, %v2343_v34 }
 0x192   : > { %v2433_v27 = vadd.f32 %v2432_v53, %v2431_v59 }
 0x193   : > { %v1365_v15 = vadd.f32 %v2345_v37, %v3663_v51 }
 0x195   : > { %v3696_v63 = vadd.f32 %v2433_v27, %v1365_v15  ;;  %v2346_v46 = vpop.f32.mrb[32].mxu0 }
 0x196   : > { %v2434_v5 = vpop.f32.mrb[32].mxu1  ;;  %v2347_v56 = vpop.f32.mrb[33].mxu0 }
 0x197   : > { %v2435_v10 = vpop.f32.mrb[33].mxu1  ;;  %v2348_v30 = vadd.f32 %v2347_v56, %v2346_v46  ;;  %v2349_v42 = vpop.f32.mrb[34].mxu0 }
 0x198   : > { %v2436_v24 = vadd.f32 %v2435_v10, %v2434_v5  ;;  %v2437_v25 = vpop.f32.mrb[34].mxu1  ;;  %v2350_v44 = vpop.f32.mrb[35].mxu0 }
 0x199   : > { %v2438_v31 = vpop.f32.mrb[35].mxu1  ;;  %v1370_v18 = vadd.f32 %v2348_v30, %v3663_v51 }
 0x19b   : > { %v3699_v43 = vadd.f32 %v2436_v24, %v1370_v18 }
 0x19d   : > { %v2352_v4 = vpop.f32.mrb[36].mxu0 }
 0x19e   : > { %v2440_v7 = vpop.f32.mrb[36].mxu1  ;;  %v2353_v12 = vpop.f32.mrb[37].mxu0 }
 0x19f   : > { %v2441_v62 = vpop.f32.mrb[37].mxu1  ;;  %v2354_v55 = vadd.f32 %v2353_v12, %v2352_v4  ;;  %v2355_v17 = vpop.f32.mrb[38].mxu0 }
 0x1a0   : > { %v2442_v61 = vadd.f32 %v2441_v62, %v2440_v7  ;;  %v2443_v58 = vpop.f32.mrb[38].mxu1  ;;  %v2356_v60 = vpop.f32.mrb[39].mxu0 }
 0x1a1   : > { %v2444_v11 = vpop.f32.mrb[39].mxu1  ;;  %v1377_v26 = vadd.f32 %v2354_v55, %v3663_v51  ;;  %v2357_v6 = vadd.f32 %v2356_v60, %v2355_v17 }
 0x1a2   : > { %v2445_v21 = vadd.f32 %v2444_v11, %v2443_v58 }
 0x1a3   : > { %v3702_v54 = vadd.f32 %v2442_v61, %v1377_v26  ;;  %v1380_v33 = vadd.f32 %v2357_v6, %v3663_v51 }
 0x1a5   : > { %v3705_v35 = vadd.f32 %v2445_v21, %v1380_v33  ;;  %v2358_v8 = vpop.f32.mrb[40].mxu0 }
 0x1a6   : > { %v2446_v49 = vpop.f32.mrb[40].mxu1  ;;  %v2359_v41 = vpop.f32.mrb[41].mxu0 }
 0x1a7   : > { %v2447_v13 = vpop.f32.mrb[41].mxu1  ;;  %v2361_v29 = vpop.f32.mrb[42].mxu0 }
 0x1a8   : > { %v2449_v19 = vpop.f32.mrb[42].mxu1  ;;  %v2362_v23 = vpop.f32.mrb[43].mxu0 }
 0x1a9   : > { %v2450_v20 = vpop.f32.mrb[43].mxu1  ;;  %v2363_v48 = vadd.f32 %v2362_v23, %v2361_v29 }
 0x1aa   : > { %v2451_v2 = vadd.f32 %v2450_v20, %v2449_v19 }
 0x1ab   : > { %v1387_v14 = vadd.f32 %v2363_v48, %v3663_v51 }
 0x1ad   : > { %v3708_v59 = vadd.f32 %v2451_v2, %v1387_v14  ;;  %v2364_v40 = vpop.f32.mrb[44].mxu0 }
 0x1ae   : > { %v2452_v3 = vpop.f32.mrb[44].mxu1  ;;  %v2365_v16 = vpop.f32.mrb[45].mxu0 }
 0x1af   : > { %v2453_v57 = vpop.f32.mrb[45].mxu1  ;;  %v2366_v27 = vadd.f32 %v2365_v16, %v2364_v40  ;;  %v2367_v34 = vpop.f32.mrb[46].mxu0 }
 0x1b0   : > { %v2454_v50 = vadd.f32 %v2453_v57, %v2452_v3  ;;  %v2455_v52 = vpop.f32.mrb[46].mxu1  ;;  %v2368_v36 = vpop.f32.mrb[47].mxu0 }
 0x1b1   : > { %v2456_v53 = vpop.f32.mrb[47].mxu1  ;;  %v1392_v37 = vadd.f32 %v2366_v27, %v3663_v51 }
 0x1b3   : > { %v3711_v15 = vadd.f32 %v2454_v50, %v1392_v37 }
 0x1b5   : > { %v2474_v46 = vpop.f32.mrb[48].mxu0 }
 0x1b6   : > { %v2562_v5 = vpop.f32.mrb[48].mxu1  ;;  %v2475_v56 = vpop.f32.mrb[49].mxu0 }
 0x1b7   : > { %v2563_v10 = vpop.f32.mrb[49].mxu1  ;;  %v2476_v42 = vadd.f32 %v2475_v56, %v2474_v46  ;;  %v2477_v44 = vpop.f32.mrb[50].mxu0 }
 0x1b8   : > { %v2564_v24 = vadd.f32 %v2563_v10, %v2562_v5  ;;  %v2565_v25 = vpop.f32.mrb[50].mxu1  ;;  %v2478_v18 = vpop.f32.mrb[51].mxu0 }
 0x1b9   : > { %v2566_v31 = vpop.f32.mrb[51].mxu1  ;;  %v1553_v7 = vadd.f32 %v2476_v42, %v3666_v38  ;;  %v2479_v62 = vadd.f32 %v2478_v18, %v2477_v44 }
 0x1ba   : > { %v2567_v30 = vadd.f32 %v2566_v31, %v2565_v25 }
 0x1bb   : > { %v1556_v58 = vadd.f32 %v2479_v62, %v3669_v39  ;;  %v3715_v4 = vadd.f32 %v2564_v24, %v1553_v7 }
 0x1bd   : > { %v2480_v12 = vpop.f32.mrb[52].mxu0  ;;  %v3717_v55 = vadd.f32 %v2567_v30, %v1556_v58 }
 0x1be   : > { %v2568_v61 = vpop.f32.mrb[52].mxu1  ;;  %v2481_v17 = vpop.f32.mrb[53].mxu0 }
 0x1bf   : > { %v2569_v51 = vpop.f32.mrb[53].mxu1  ;;  %v2483_v26 = vpop.f32.mrb[54].mxu0 }
 0x1c0   : > { %v2571_v11 = vpop.f32.mrb[54].mxu1  ;;  %v2484_v6 = vpop.f32.mrb[55].mxu0 }
 0x1c1   : > { %v2572_v21 = vpop.f32.mrb[55].mxu1  ;;  %v2485_v49 = vadd.f32 %v2484_v6, %v2483_v26 }
 0x1c2   : > { %v2573_v60 = vadd.f32 %v2572_v21, %v2571_v11 }
 0x1c3   : > { %v1563_v38 = vadd.f32 %v2485_v49, %v3672_v9 }
 0x1c5   : > { %v2486_v39 = vpop.f32.mrb[56].mxu0  ;;  %v3720_v41 = vadd.f32 %v2573_v60, %v1563_v38 }
 0x1c6   : > { %v2574_v33 = vpop.f32.mrb[56].mxu1  ;;  %v2487_v2 = vpop.f32.mrb[57].mxu0 }
 0x1c7   : > { %v2575_v13 = vpop.f32.mrb[57].mxu1  ;;  %v2488_v29 = vadd.f32 %v2487_v2, %v2486_v39  ;;  %v2489_v23 = vpop.f32.mrb[58].mxu0 }
 0x1c8   : > { %v2576_v19 = vadd.f32 %v2575_v13, %v2574_v33  ;;  %v2577_v8 = vpop.f32.mrb[58].mxu1  ;;  %v2490_v48 = vpop.f32.mrb[59].mxu0 }
 0x1c9   : > { %v2578_v20 = vpop.f32.mrb[59].mxu1  ;;  %v1568_v3 = vadd.f32 %v2488_v29, %v3675_v1 }
 0x1cb   : > { %v3723_v50 = vadd.f32 %v2576_v19, %v1568_v3 }
 0x1cd   : > { %v2492_v9 = vpop.f32.mrb[60].mxu0 }
 0x1ce   : > { %v2580_v14 = vpop.f32.mrb[60].mxu1  ;;  %v2493_v16 = vpop.f32.mrb[61].mxu0 }
 0x1cf   : > { %v2581_v57 = vpop.f32.mrb[61].mxu1  ;;  %v2494_v34 = vadd.f32 %v2493_v16, %v2492_v9  ;;  %v2495_v36 = vpop.f32.mrb[62].mxu0 }
 0x1d0   : > { %v2582_v52 = vadd.f32 %v2581_v57, %v2580_v14  ;;  %v2583_v40 = vpop.f32.mrb[62].mxu1  ;;  %v2496_v37 = vpop.f32.mrb[63].mxu0 }
 0x1d1   : > { %v2584_v53 = vpop.f32.mrb[63].mxu1  ;;  %v1575_v5 = vadd.f32 %v2494_v34, %v3678_v32  ;;  %v2497_v10 = vadd.f32 %v2496_v37, %v2495_v36 }
 0x1d2   : > { %v2585_v27 = vadd.f32 %v2584_v53, %v2583_v40 }
 0x1d3   : > { %v1578_v25 = vadd.f32 %v2497_v10, %v3681_v47  ;;  %v3727_v46 = vadd.f32 %v2582_v52, %v1575_v5 }
 0x1d5   : > { %v2498_v56 = vpop.f32.mrb[64].mxu0  ;;  %v3729_v42 = vadd.f32 %v2585_v27, %v1578_v25 }
 0x1d6   : > { %v2586_v24 = vpop.f32.mrb[64].mxu1  ;;  %v2499_v44 = vpop.f32.mrb[65].mxu0 }
 0x1d7   : > { %v2587_v1 = vpop.f32.mrb[65].mxu1  ;;  %v2501_v7 = vpop.f32.mrb[66].mxu0 }
 0x1d8   : > { %v2589_v31 = vpop.f32.mrb[66].mxu1  ;;  %v2502_v62 = vpop.f32.mrb[67].mxu0 }
 0x1d9   : > { %v2590_v30 = vpop.f32.mrb[67].mxu1  ;;  %v2503_v61 = vadd.f32 %v2502_v62, %v2501_v7 }
 0x1da   : > { %v2591_v18 = vadd.f32 %v2590_v30, %v2589_v31 }
 0x1db   : > { %v1585_v32 = vadd.f32 %v2503_v61, %v3684_v45 }
 0x1dd   : > { %v2504_v47 = vpop.f32.mrb[68].mxu0  ;;  %v3732_v17 = vadd.f32 %v2591_v18, %v1585_v32 }
 0x1de   : > { %v2592_v58 = vpop.f32.mrb[68].mxu1  ;;  %v2505_v60 = vpop.f32.mrb[69].mxu0 }
 0x1df   : > { %v2593_v51 = vpop.f32.mrb[69].mxu1  ;;  %v2506_v26 = vadd.f32 %v2505_v60, %v2504_v47  ;;  %v2507_v6 = vpop.f32.mrb[70].mxu0 }
 0x1e0   : > { %v2594_v11 = vadd.f32 %v2593_v51, %v2592_v58  ;;  %v2595_v12 = vpop.f32.mrb[70].mxu1  ;;  %v2508_v49 = vpop.f32.mrb[71].mxu0 }
 0x1e1   : > { %v2596_v21 = vpop.f32.mrb[71].mxu1  ;;  %v1590_v33 = vadd.f32 %v2506_v26, %v3687_v0 }
 0x1e3   : > { %v3735_v19 = vadd.f32 %v2594_v11, %v1590_v33 }
 0x1e5   : > { %v2510_v45 = vpop.f32.mrb[72].mxu0 }
 0x1e6   : > { %v2598_v38 = vpop.f32.mrb[72].mxu1  ;;  %v2511_v2 = vpop.f32.mrb[73].mxu0 }
 0x1e7   : > { %v2599_v13 = vpop.f32.mrb[73].mxu1  ;;  %v2512_v23 = vadd.f32 %v2511_v2, %v2510_v45  ;;  %v2513_v48 = vpop.f32.mrb[74].mxu0 }
 0x1e8   : > { %v2600_v8 = vadd.f32 %v2599_v13, %v2598_v38  ;;  %v2601_v39 = vpop.f32.mrb[74].mxu1  ;;  %v2514_v3 = vpop.f32.mrb[75].mxu0 }
 0x1e9   : > { %v2602_v20 = vpop.f32.mrb[75].mxu1  ;;  %v1597_v14 = vadd.f32 %v2512_v23, %v3690_v28  ;;  %v2515_v57 = vadd.f32 %v2514_v3, %v2513_v48 }
 0x1ea   : > { %v2603_v29 = vadd.f32 %v2602_v20, %v2601_v39 }
 0x1eb   : > { %v1600_v40 = vadd.f32 %v2515_v57, %v3693_v22  ;;  %v3739_v9 = vadd.f32 %v2600_v8, %v1597_v14 }
 0x1ed   : > { %v2516_v16 = vpop.f32.mrb[76].mxu0  ;;  %v3741_v34 = vadd.f32 %v2603_v29, %v1600_v40 }
 0x1ee   : > { %v2604_v52 = vpop.f32.mrb[76].mxu1  ;;  %v2517_v36 = vpop.f32.mrb[77].mxu0 }
 0x1ef   : > { %v2605_v0 = vpop.f32.mrb[77].mxu1  ;;  %v2519_v5 = vpop.f32.mrb[78].mxu0 }
 0x1f0   : > { %v2607_v53 = vpop.f32.mrb[78].mxu1  ;;  %v2520_v10 = vpop.f32.mrb[79].mxu0 }
 0x1f1   : > { %v2608_v27 = vpop.f32.mrb[79].mxu1  ;;  %v2521_v24 = vadd.f32 %v2520_v10, %v2519_v5 }
 0x1f2   : > { %v2609_v37 = vadd.f32 %v2608_v27, %v2607_v53 }
 0x1f3   : > { %v1607_v28 = vadd.f32 %v2521_v24, %v3696_v63 }
 0x1f5   : > { %v2522_v22 = vpop.f32.mrb[80].mxu0  ;;  %v1728_v44 = vadd.f32 %v2609_v37, %v1607_v28 }
 0x1f6   : > { %v2610_v25 = vpop.f32.mrb[80].mxu1  ;;  %v2523_v18 = vpop.f32.mrb[81].mxu0 }
 0x1f7   : > { %v2611_v1 = vpop.f32.mrb[81].mxu1  ;;  %v2524_v7 = vadd.f32 %v2523_v18, %v2522_v22  ;;  %v2525_v62 = vpop.f32.mrb[82].mxu0 }
 0x1f8   : > { %v2612_v31 = vadd.f32 %v2611_v1, %v2610_v25  ;;  %v2613_v56 = vpop.f32.mrb[82].mxu1  ;;  %v2526_v61 = vpop.f32.mrb[83].mxu0 }
 0x1f9   : > { %v2614_v30 = vpop.f32.mrb[83].mxu1  ;;  %v1612_v58 = vadd.f32 %v2524_v7, %v3699_v43 }
 0x1fb   : > { %v1733_v11 = vadd.f32 %v2612_v31, %v1612_v58 }
 0x1fd   : > { %v2528_v21 = vpop.f32.mrb[84].mxu0 }
 0x1fe   : > { %v2616_v32 = vpop.f32.mrb[84].mxu1  ;;  %v2529_v63 = vpop.f32.mrb[85].mxu0 }
 0x1ff   : > { %v2617_v51 = vpop.f32.mrb[85].mxu1  ;;  %v2530_v6 = vadd.f32 %v2529_v63, %v2528_v21  ;;  %v2531_v49 = vpop.f32.mrb[86].mxu0 }
 0x200   : > { %v2618_v12 = vadd.f32 %v2617_v51, %v2616_v32  ;;  %v2619_v47 = vpop.f32.mrb[86].mxu1  ;;  %v2532_v33 = vpop.f32.mrb[87].mxu0 }
 0x201   : > { %v2620_v60 = vpop.f32.mrb[87].mxu1  ;;  %v1619_v38 = vadd.f32 %v2530_v6, %v3702_v54  ;;  %v2533_v13 = vadd.f32 %v2532_v33, %v2531_v49 }
 0x202   : > { %v2621_v26 = vadd.f32 %v2620_v60, %v2619_v47 }
 0x203   : > { %v1622_v39 = vadd.f32 %v2533_v13, %v3705_v35  ;;  %v1740_v43 = vadd.f32 %v2618_v12, %v1619_v38 }
 0x205   : > { %v2534_v2 = vpop.f32.mrb[88].mxu0  ;;  %v1743_v23 = vadd.f32 %v2621_v26, %v1622_v39 }
 0x206   : > { %v2622_v8 = vpop.f32.mrb[88].mxu1  ;;  %v2535_v48 = vpop.f32.mrb[89].mxu0 }
 0x207   : > { %v2623_v45 = vpop.f32.mrb[89].mxu1  ;;  %v2537_v14 = vpop.f32.mrb[90].mxu0 }
 0x208   : > { %v2625_v20 = vpop.f32.mrb[90].mxu1  ;;  %v2538_v57 = vpop.f32.mrb[91].mxu0 }
 0x209   : > { %v2626_v29 = vpop.f32.mrb[91].mxu1  ;;  %v2539_v52 = vadd.f32 %v2538_v57, %v2537_v14 }
 0x20a   : > { %v2627_v3 = vadd.f32 %v2626_v29, %v2625_v20 }
 0x20b   : > { %v1629_v0 = vadd.f32 %v2539_v52, %v3708_v59 }
 0x20d   : > { %v2540_v27 = vpop.f32.mrb[92].mxu0  ;;  %v3748_v35 = vadd.f32 %v2627_v3, %v1629_v0 }
 0x20e   : > { %v2628_v40 = vpop.f32.mrb[92].mxu1  ;;  %v2541_v37 = vpop.f32.mrb[93].mxu0 }
 0x20f   : > { %v2629_v53 = vpop.f32.mrb[93].mxu1  ;;  %v2542_v5 = vadd.f32 %v2541_v37, %v2540_v27  ;;  %v2543_v10 = vpop.f32.mrb[94].mxu0 }
 0x210   : > { %v2630_v54 = vadd.f32 %v2629_v53, %v2628_v40  ;;  %v2631_v16 = vpop.f32.mrb[94].mxu1  ;;  %v2544_v24 = vpop.f32.mrb[95].mxu0 }
 0x211   : > { %v2632_v36 = vpop.f32.mrb[95].mxu1  ;;  %v1634_v25 = vadd.f32 %v2542_v5, %v3711_v15 }
 0x213   : > { %v1755_v31 = vadd.f32 %v2630_v54, %v1634_v25 }
 0x215   : > { %v2672_v59 = vpop.f32.mrb[96].mxu0 }
 0x216   : > { %v2684_v28 = vpop.f32.mrb[96].mxu1  ;;  %v1794_v7 = vpop.f32.mrb[97].mxu0 }
 0x217   : > { %v1838_v1 = vpop.f32.mrb[97].mxu1  ;;  %v1795_v61 = vadd.f32 %v1794_v7, %v3715_v4  ;;  %v2673_v58 = vpop.f32.mrb[98].mxu0 }
 0x218   : > { %v1839_v56 = vadd.f32 %v1838_v1, %v3739_v9  ;;  %v2685_v22 = vpop.f32.mrb[98].mxu1  ;;  %v1805_v51 = vadd.f32 %v2673_v58, %v3720_v41  ;;  %v1797_v15 = vpop.f32.mrb[99].mxu0 }
 0x219   : > { %v1849_v30 = vadd.f32 %v2685_v22, %v1728_v44  ;;  %v1841_v18 = vpop.f32.mrb[99].mxu1  ;;  %v1798_v47 = vadd.f32 %v1797_v15, %v3717_v55  ;;  %v1881_v60 = vmax.f32 %v1795_v61, 0.0 }
 0x21a   : > { %v1842_v62 = vadd.f32 %v1841_v18, %v3741_v34  ;;  %v1889_v32 = vmax.f32 %v1839_v56, 0.0 }
 0x21b   : > { %v1882_v44 = vmax.f32 %v1798_v47, 0.0  ;;  %v1891_v13 = vmax.f32 %v1849_v30, 0.0 }
 0x21c   : > { %v1890_v12 = vmax.f32 %v1842_v62, 0.0 }
 0x21d   : > { %v2238_v49 = vpack.c.bf16 %v1882_v44, %v1881_v60  ;;  %v2676_v4 = vpop.f32.mrb[100].mxu0 }
 0x21e   : > { %v2258_v21 = vpack.c.bf16 %v1890_v12, %v1889_v32  ;;  %v2688_v9 = vpop.f32.mrb[100].mxu1  ;;  %v1817_v41 = vadd.f32 %v2676_v4, %v3727_v46  ;;  %v1809_v8 = vpop.f32.mrb[101].mxu0 }
 0x21f   : > { %v1861_v63 = vadd.f32 %v2688_v9, %v1740_v43  ;;  %v1853_v26 = vpop.f32.mrb[101].mxu1  ;;  %2239 = vst [vmem:[%s3208_s1] sm:$0xff] %v2238_v49   ;;  %v1810_v45 = vadd.f32 %v1809_v8, %v3723_v50  ;;  %v2677_v43 = vpop.f32.mrb[102].mxu0 }
 0x220   : > { %2278 = vst [vmem:[%s3208_s1 + $0x20] sm:$0xff] %v2258_v21   ;;  %v1854_v6 = vadd.f32 %v1853_v26, %v1733_v11  ;;  %v2689_v34 = vpop.f32.mrb[102].mxu1  ;;  %v1820_v2 = vadd.f32 %v2677_v43, %v3729_v42  ;;  %v1812_v29 = vpop.f32.mrb[103].mxu0  ;;  %v1885_v46 = vmax.f32 %v1817_v41, 0.0 }
 0x221   : > { %v1864_v33 = vadd.f32 %v2689_v34, %v1743_v23  ;;  %v1856_v38 = vpop.f32.mrb[103].mxu1  ;;  %v1893_v39 = vmax.f32 %v1861_v63, 0.0  ;;  %v1883_v23 = vmax.f32 %v1805_v51, 0.0  ;;  %v1884_v48 = vmax.f32 %v1810_v45, 0.0 }
 0x222   : > { %v1892_v55 = vmax.f32 %v1854_v6, 0.0  ;;  %v1886_v14 = vmax.f32 %v1820_v2, 0.0 }
 0x223   : > { %v1894_v20 = vmax.f32 %v1864_v33, 0.0  ;;  %v2243_v52 = vpack.c.bf16 %v1884_v48, %v1883_v23 }
 0x224   : > { %v2263_v11 = vpack.c.bf16 %v1892_v55, %v1891_v13  ;;  %v2248_v0 = vpack.c.bf16 %v1886_v14, %v1885_v46 }
 0x225   : > { %v2268_v3 = vpack.c.bf16 %v1894_v20, %v1893_v39  ;;  %2275 = vst [vmem:[%s3208_s1 + $0x8] sm:$0xff] %v2243_v52   ;;  %v2680_v42 = vpop.f32.mrb[104].mxu0 }
 0x226   : > { %2279 = vst [vmem:[%s3208_s1 + $0x28] sm:$0xff] %v2263_v11   ;;  %v2692_v57 = vpop.f32.mrb[104].mxu1  ;;  %2276 = vst [vmem:[%s3208_s1 + $0x10] sm:$0xff] %v2248_v0   ;;  %v1832_v16 = vadd.f32 %v2680_v42, %v3735_v19  ;;  %v1824_v27 = vpop.f32.mrb[105].mxu0 }
 0x227   : > { %2280 = vst [vmem:[%s3208_s1 + $0x30] sm:$0xff] %v2268_v3   ;;  %v1876_v50 = vadd.f32 %v2692_v57, %v1755_v31  ;;  %v1868_v40 = vpop.f32.mrb[105].mxu1  ;;  %v2681_v37 = vpop.f32.mrb[106].mxu0 }
 0x228   : > { %v2693_v53 = vpop.f32.mrb[106].mxu1  ;;  %v1826_v10 = vpop.f32.mrb[107].mxu0  ;;  %v1888_v1 = vmax.f32 %v1832_v16, 0.0 }
 0x229   : > { %v1870_v54 = vpop.f32.mrb[107].mxu1  ;;  %v1896_v5 = vmax.f32 %v1876_v50, 0.0  ;;  %v1827_v25 = vadd.f32 %v1826_v10, %v3732_v17 }
 0x22a   : > { %v1871_v36 = vadd.f32 %v1870_v54, %v3748_v35 }
 0x22b   : > { %v1887_v31 = vmax.f32 %v1827_v25, 0.0 }
 0x22c   : > { %v1895_v24 = vmax.f32 %v1871_v36, 0.0 }
 0x22d   : > { %v2253_v19 = vpack.c.bf16 %v1888_v1, %v1887_v31 }
 0x22e   : > { %v2273_v28 = vpack.c.bf16 %v1896_v5, %v1895_v24 }
 0x22f   : > { %2277 = vst [vmem:[%s3208_s1 + $0x18] sm:$0xff] %v2253_v19  }
 0x230   : > { %2281 = vst [vmem:[%s3208_s1 + $0x38] sm:$0xff] %v2273_v28  }
 0x231   : > { %2968 = shalt.err (!%p2965_p2)
}
 0x232   : > { %s2969_s11 = scalar_lea.hbm %s3775_s30, 1024  ;;  %s2973_s21 = scalar_lea.hbm %s3837_s3, 4096 }
 0x233   : > { %p2970_p5 = scmp.ne.s32.totalorder %s3775_s30, %s2969_s11  ;;  %p2974_p9 = scmp.lt.u32.totalorder %s3775_s30, %s3837_s3 }
 0x234   : > { %p2975_p11 = scmp.lt.u32.totalorder %s2973_s21, %s2969_s11  ;;  %p2977_p1 = scmp.lt.u32.totalorder %s2969_s11, %s3775_s30 }
 0x235   : > { %p2971_p6 = pnand %p2970_p5, %p3877_p4 }
 0x236   : > { %p2976_p13 = por %p2975_p11, %p2974_p9 }
 0x237   : > { %p2972_p7 = pneg %p2971_p6 }
 0x238   : > { %p2978_p3 = por %p2977_p1, %p2976_p13 }
 0x23a   : > { %p2979_p8 = pnand %p2978_p3, %p2972_p7 }
 0x23c   : > { %2982 = shalt.err (!%p2979_p8)
}
 0x23d   : > { %s3063_s22 = smov 64   ;;  %s3064_s23 = smov 4  }
 0x23e   : > { %2714 = dma.vmem_to_hbm [thread:$0]  (%p3877_p4), %s3777_s16, 1024, %s3775_s30, %s3782_s28, %s3063_s22, %s3063_s22, %s3064_s23  }
 0x23f PF: > { %p2726_p10 = scmp.ge.s32.totalorder %s3055_s19, 2  ;;  %s2009_s8 = sand.u32 1, %s3027_s12  }
 0x240   : > { %p3878_p12 = scmp.ne.s32.totalorder %s3856_s27, 0  ;;  %s2010_s24 = scalar_lea.sflag [#allocation6], %s2009_s8 }
 0x242   : > { %p2721_p0 = pnand %p2726_p10, %p3878_p12 }
 0x244   : > { %3022 = dma.done.wait (!%p2721_p0), %s2010_s24, 1024  }
 0x245   : > { %3024 = vsyncadd (!%p2721_p0), %s2010_s24, 4294966272  ;;  %s17_s19 = sadd.s32 1, %s3055_s19   ;;  %s3879_s16 = sld [smem:[#allocation15_spill]] }
 0x246   : > { %p14_p2 = scmp.ge.s32.totalorder %s17_s19, 6   ;;  %s3880_s26 = sld [smem:[#allocation16_spill]] }
 0x247   : > { %s3881_s18 = sld [smem:[#allocation17_spill]]  ;;  %s3882_s12 = smov %s3031_s13 }
 0x248   : > { %s3883_s13 = smov %s3035_s14  ;;  %s3884_s14 = smov %s3164_s5 }
 0x249   : > { %s3885_s15 = smov %s3047_s17  ;;  %16 = sbr.rel (!%p14_p2) target bundleno = 8 (0x8), region = 70 }
 0x24c   : > { %s3886_s17 = smov %s3880_s26 }
 0x250   :  { %2015 = vsyncpa [#allocation5], 1 }
 0x251   :  { %2017 = vsyncpa [#allocation5 + $0x1], 1 }
 0x252   :  { %2018 = vsyncpa [#allocation6], 1 }
 0x253   :  { %2020 = vsyncpa [#allocation6 + $0x1], 1 }
 0x254   :  { %2021 = vsyncmov [#allocation3] }
 0x257   :  { %s2022_s27 = vpop.sfrf %2021 }
 0x258   :  { %p2217_p4 = scmp.ne.s32.totalorder %s2022_s27, 0 }
 0x25a   :  { %2026 = shalt.err (%p2217_p4)  }

</bundles_post_ra>
